<compile_context>
chip_gen: v7x
topology: tpu7x:2x2x1
jax: 0.10.0
libtpu: 0.0.40
codegen_flags: <defaults>
</compile_context>

<pallas_src>
import functools
import math

import jax
import jax.numpy as jnp
from jax.experimental import pallas as pl
from jax.experimental.pallas import tpu as pltpu


def _round_up(x, m):
    return (x + m - 1) // m * m


# ---------------------------------------------------------------------------
# Fused Pallas kernels:  out = act( (X @ W) + bias [+ residual] )
#   X:(M,K) bf16   W:(K,N) bf16 (BN scale pre-folded)   bias:(1,N) f32
#   grid = (M_tiles, N_tiles, K_tiles); f32 VMEM accumulator (pattern P3).
# ---------------------------------------------------------------------------
def _mm_kernel(x_ref, w_ref, b_ref, o_ref, acc_ref, *, relu):
    @pl.when(pl.program_id(2) == 0)
    def _():
        acc_ref[...] = jnp.zeros_like(acc_ref)

    acc_ref[...] += jnp.dot(x_ref[...], w_ref[...],
                            preferred_element_type=jnp.float32)

    @pl.when(pl.program_id(2) == pl.num_programs(2) - 1)
    def _():
        out = acc_ref[...] + b_ref[...]
        if relu:
            out = jnp.maximum(out, 0.0)
        o_ref[...] = out.astype(o_ref.dtype)


def _mm_res_kernel(x_ref, w_ref, b_ref, r_ref, o_ref, acc_ref, *, relu):
    @pl.when(pl.program_id(2) == 0)
    def _():
        acc_ref[...] = jnp.zeros_like(acc_ref)

    acc_ref[...] += jnp.dot(x_ref[...], w_ref[...],
                            preferred_element_type=jnp.float32)

    @pl.when(pl.program_id(2) == pl.num_programs(2) - 1)
    def _():
        out = acc_ref[...] + b_ref[...] + r_ref[...].astype(jnp.float32)
        if relu:
            out = jnp.maximum(out, 0.0)
        o_ref[...] = out.astype(o_ref.dtype)


def fused_matmul_bias(x, w, bias, residual=None, relu=True,
                      out_dtype=jnp.bfloat16):
    """x:(M,K), w:(K,N) BN-folded, bias:(N,), residual:(M,N) or None."""
    M, K = x.shape
    K2, N = w.shape
    assert K == K2
    if residual is not None:
        assert residual.shape == (M, N), (residual.shape, (M, N))

    # Tile selection: bf16 sublane packing -> M rounded to 16; lane-dense N.
    tm = min(256, _round_up(M, 16))
    M_pad = _round_up(M, tm)
    N_pad = _round_up(N, 128)
    tn = N_pad if N_pad <= 512 else (256 if N_pad % 256 == 0 else 128)
    if K <= 1024:
        tk, K_pad = K, K          # single K step, block equals full K dim
    else:
        tk = 512                  # 128-aligned (v5e) / 256-aligned (v6e, v7x)
        K_pad = _round_up(K, tk)

    xb = jnp.pad(x.astype(jnp.bfloat16), ((0, M_pad - M), (0, K_pad - K)))
    wb = jnp.pad(w.astype(jnp.bfloat16), ((0, K_pad - K), (0, N_pad - N)))
    bb = jnp.pad(bias.astype(jnp.float32), (0, N_pad - N)).reshape(1, N_pad)

    in_specs = [
        pl.BlockSpec((tm, tk), lambda i, j, k: (i, k)),
        pl.BlockSpec((tk, tn), lambda i, j, k: (k, j)),
        pl.BlockSpec((1, tn), lambda i, j, k: (0, j)),
    ]
    args = [xb, wb, bb]
    if residual is not None:
        rb = jnp.pad(residual.astype(jnp.bfloat16),
                     ((0, M_pad - M), (0, N_pad - N)))
        in_specs.append(pl.BlockSpec((tm, tn), lambda i, j, k: (i, j)))
        args.append(rb)
        kernel = functools.partial(_mm_res_kernel, relu=relu)
    else:
        kernel = functools.partial(_mm_kernel, relu=relu)

    grid = (M_pad // tm, N_pad // tn, K_pad // tk)
    flops = 2 * M_pad * K_pad * N_pad
    bytes_accessed = 2 * (M_pad * K_pad + K_pad * N_pad + 2 * M_pad * N_pad)

    out = pl.pallas_call(
        kernel,
        out_shape=jax.ShapeDtypeStruct((M_pad, N_pad), out_dtype),
        grid=grid,
        in_specs=in_specs,
        out_specs=pl.BlockSpec((tm, tn), lambda i, j, k: (i, j)),
        scratch_shapes=[pltpu.VMEM((tm, tn), jnp.float32)],
        compiler_params=pltpu.CompilerParams(
            dimension_semantics=("parallel", "parallel", "arbitrary")),
        cost_estimate=pl.CostEstimate(
            flops=flops, transcendentals=0, bytes_accessed=bytes_accessed),
    )(*args)
    return out[:M, :N]


# ---------------------------------------------------------------------------
# Conv lowering glue (NHWC activations, bf16)
# ---------------------------------------------------------------------------
def conv1x1_bn(x_nhwc, w_kn, bias, stride=1, relu=True, residual=None,
               out_dtype=jnp.bfloat16):
    """1x1 conv (bias=False) + folded BN (+residual) (+ReLU): pure matmul."""
    if stride > 1:
        x_nhwc = x_nhwc[:, ::stride, ::stride, :]
    n, h, w, c = x_nhwc.shape
    res_flat = None
    if residual is not None:
        res_flat = residual.reshape(n * h * w, residual.shape[-1])
    out = fused_matmul_bias(x_nhwc.reshape(n * h * w, c), w_kn, bias,
                            residual=res_flat, relu=relu, out_dtype=out_dtype)
    return out.reshape(n, h, w, -1)


def im2col(x_nhwc, kh, kw, stride, padding, dilation=1):
    """Shifted-slice im2col, done in the activation dtype (bf16)."""
    n, h, w, c = x_nhwc.shape
    ho = (h + 2 * padding - dilation * (kh - 1) - 1) // stride + 1
    wo = (w + 2 * padding - dilation * (kw - 1) - 1) // stride + 1
    xp = jnp.pad(x_nhwc, ((0, 0), (padding, padding), (padding, padding), (0, 0)))
    cols = []
    for i in range(kh):
        for j in range(kw):
            hi, wi = i * dilation, j * dilation
            cols.append(xp[:, hi:hi + stride * (ho - 1) + 1:stride,
                              wi:wi + stride * (wo - 1) + 1:stride, :])
    patches = jnp.concatenate(cols, axis=-1)          # (n, ho, wo, kh*kw*c)
    return patches.reshape(n * ho * wo, kh * kw * c), (n, ho, wo)


def conv3x3_bn(x_nhwc, w_kn, bias, stride=1, padding=1, dilation=1,
               relu=True, out_dtype=jnp.bfloat16):
    """3x3 conv (bias=False) + folded BN (+ReLU) via im2col matmul."""
    patches, (n, ho, wo) = im2col(x_nhwc, 3, 3, stride, padding, dilation)
    out = fused_matmul_bias(patches, w_kn, bias, relu=relu, out_dtype=out_dtype)
    return out.reshape(n, ho, wo, -1)


# ---------------------------------------------------------------------------
# Bottleneck forward (radix=0 standard path)
# ---------------------------------------------------------------------------
def bottleneck_forward(x_nchw, params):
    stride = params['stride']
    dilation = params['dilation']
    x = jnp.transpose(x_nchw, (0, 2, 3, 1)).astype(jnp.bfloat16)   # NCHW -> NHWC

    # conv1 (1x1) + bn1 + ReLU
    out = conv1x1_bn(x, params['w1'], params['b1'], relu=True)

    # conv2 (3x3, stride, padding=dilation) + bn2 + ReLU
    out = conv3x3_bn(out, params['w2'], params['b2'], stride=stride,
                     padding=dilation, dilation=dilation, relu=True)

    # residual branch (downsample = 1x1 conv + BN when provided)
    if 'wd' in params:
        residual = conv1x1_bn(x, params['wd'], params['bd'], stride=stride,
                              relu=False)
    else:
        residual = x

    # conv3 (1x1) + bn3 + residual add + ReLU, f32 output
    out = conv1x1_bn(out, params['w3'], params['b3'], relu=True,
                     residual=residual, out_dtype=jnp.float32)
    return jnp.transpose(out, (0, 3, 1, 2))           # NHWC -> NCHW


# ---------------------------------------------------------------------------
# Parameter preparation: PyTorch-style init, BN folded into weights once.
# ---------------------------------------------------------------------------
def make_conv(key, cout, cin, kh, kw):
    n = kh * kw * cout
    return jax.random.normal(key, (cout, cin, kh, kw), jnp.float32) * math.sqrt(2.0 / n)


def make_bn(c):
    # (gamma, beta, running_mean, running_var, eps) with default init
    return (jnp.ones((c,), jnp.float32), jnp.zeros((c,), jnp.float32),
            jnp.zeros((c,), jnp.float32), jnp.ones((c,), jnp.float32), 1e-5)


def fold_conv_bn(w_torch, bn):
    """(Cout,Cin,kh,kw) -> (kh*kw*Cin, Cout) with BN scale folded in; bias out."""
    gamma, beta, mean, var, eps = bn
    scale = gamma / jnp.sqrt(var + eps)
    cout, cin, kh, kw = w_torch.shape
    w_mat = jnp.transpose(w_torch, (2, 3, 1, 0)).reshape(kh * kw * cin, cout)
    w_mat = w_mat * scale[None, :]
    bias = beta - mean * scale
    return w_mat.astype(jnp.bfloat16), bias.astype(jnp.float32)


def init_params(key, inplanes, planes, stride=1, cardinality=1,
                bottleneck_width=64, dilation=1):
    group_width = int(planes * (bottleneck_width / 64.0)) * cardinality
    keys = jax.random.split(key, 4)
    p = {'stride': stride, 'dilation': dilation}
    p['w1'], p['b1'] = fold_conv_bn(
        make_conv(keys[0], group_width, inplanes, 1, 1), make_bn(group_width))
    p['w2'], p['b2'] = fold_conv_bn(
        make_conv(keys[1], group_width, group_width, 3, 3), make_bn(group_width))
    p['w3'], p['b3'] = fold_conv_bn(
        make_conv(keys[2], planes * 4, group_width, 1, 1), make_bn(planes * 4))
    if stride != 1 or inplanes != planes * 4:
        # downsample: 1x1 conv (stride) + BN
        p['wd'], p['bd'] = fold_conv_bn(
            make_conv(keys[3], planes * 4, inplanes, 1, 1), make_bn(planes * 4))
    return p


if __name__ == "__main__":
    key = jax.random.PRNGKey(0)
    pkey, xkey = jax.random.split(key)

    batch, inplanes, planes, hw, stride = 2, 32, 16, 16, 1
    params = init_params(pkey, inplanes=inplanes, planes=planes, stride=stride)
    x = jax.random.normal(xkey, (batch, inplanes, hw, hw), jnp.float32)  # NCHW

    fwd = jax.jit(lambda inp: bottleneck_forward(inp, params))
    out = jax.block_until_ready(fwd(x))

    assert out.shape == (batch, planes * 4, hw // stride, hw // stride), out.shape
    assert bool(jnp.all(jnp.isfinite(out)))
    assert bool(jnp.all(out >= 0))   # final ReLU
    print("KERNEL_OK")
</pallas_src>

<mosaic_0001>
module attributes {stable_mosaic.version = 11 : i64} {
  func.func @_mm_kernel(%arg0: i32, %arg1: i32, %arg2: i32, %arg3: memref<256x32xbf16, #tpu.memory_space<vmem>>, %arg4: memref<32x128xbf16, #tpu.memory_space<vmem>>, %arg5: memref<1x128xf32, #tpu.memory_space<vmem>>, %arg6: memref<256x128xbf16, #tpu.memory_space<vmem>>, %arg7: memref<256x128xf32, #tpu.memory_space<vmem>>) attributes {dimension_semantics = [#tpu.dimension_semantics<parallel>, #tpu.dimension_semantics<parallel>, #tpu.dimension_semantics<arbitrary>], iteration_bounds = array<i64: 2, 1, 1>, scalar_prefetch = 0 : i64, scratch_operands = 1 : i64, tpu.core_type = #tpu.core_type<tc>, window_params = [{transform_indices = @transform_0, window_bounds = array<i64: 256, 32>}, {transform_indices = @transform_1, window_bounds = array<i64: 32, 128>}, {transform_indices = @transform_2, window_bounds = array<i64: 1, 128>}, {transform_indices = @transform_3, window_bounds = array<i64: 256, 128>}]} {
    %c0_i32 = arith.constant 0 : i32
    %0 = arith.cmpi eq, %arg2, %c0_i32 : i32
    %1 = arith.extui %0 : i1 to i32
    %c0_i32_0 = arith.constant 0 : i32
    %2 = arith.cmpi ne, %1, %c0_i32_0 : i32
    scf.if %2 {
      %cst_10 = arith.constant 0.000000e+00 : f32
      %12 = vector.broadcast %cst_10 : f32 to vector<256x128xf32>
      %c0_11 = arith.constant 0 : index
      %c0_12 = arith.constant 0 : index
      %13 = vector.load %arg7[%c0_11, %c0_12] : memref<256x128xf32, #tpu.memory_space<vmem>>, vector<256x128xf32>
      tpu.vector_store %arg7[%c0_11, %c0_12], %12 {strides = array<i32>} : memref<256x128xf32, #tpu.memory_space<vmem>>, vector<256x128xf32>,
    } else {
    }
    %c0 = arith.constant 0 : index
    %c0_1 = arith.constant 0 : index
    %3 = vector.load %arg7[%c0, %c0_1] : memref<256x128xf32, #tpu.memory_space<vmem>>, vector<256x128xf32>
    %c0_2 = arith.constant 0 : index
    %c0_3 = arith.constant 0 : index
    %4 = vector.load %arg3[%c0_2, %c0_3] : memref<256x32xbf16, #tpu.memory_space<vmem>>, vector<256x32xbf16>
    %c0_4 = arith.constant 0 : index
    %c0_5 = arith.constant 0 : index
    %5 = vector.load %arg4[%c0_4, %c0_5] : memref<32x128xbf16, #tpu.memory_space<vmem>>, vector<32x128xbf16>
    %cst = arith.constant dense<0.000000e+00> : vector<256x128xf32>
    %6 = tpu.matmul %4, %5, %cst {dimension_numbers = #tpu.dot_dimension_numbers<[1], [0], [0], [1], [0, 0, 1, 1], [], []>} : vector<256x32xbf16>, vector<32x128xbf16>, vector<256x128xf32> -> vector<256x128xf32>
    %7 = arith.addf %3, %6 : vector<256x128xf32>
    %c0_6 = arith.constant 0 : index
    %c0_7 = arith.constant 0 : index
    %8 = vector.load %arg7[%c0_6, %c0_7] : memref<256x128xf32, #tpu.memory_space<vmem>>, vector<256x128xf32>
    tpu.vector_store %arg7[%c0_6, %c0_7], %7 {strides = array<i32>} : memref<256x128xf32, #tpu.memory_space<vmem>>, vector<256x128xf32>,
    %c0_i32_8 = arith.constant 0 : i32
    %9 = arith.cmpi eq, %arg2, %c0_i32_8 : i32
    %10 = arith.extui %9 : i1 to i32
    %c0_i32_9 = arith.constant 0 : i32
    %11 = arith.cmpi ne, %10, %c0_i32_9 : i32
    scf.if %11 {
      %c0_10 = arith.constant 0 : index
      %c0_11 = arith.constant 0 : index
      %12 = vector.load %arg7[%c0_10, %c0_11] : memref<256x128xf32, #tpu.memory_space<vmem>>, vector<256x128xf32>
      %c0_12 = arith.constant 0 : index
      %c0_13 = arith.constant 0 : index
      %13 = vector.load %arg5[%c0_12, %c0_13] : memref<1x128xf32, #tpu.memory_space<vmem>>, vector<1x128xf32>
      %14 = vector.broadcast %13 : vector<1x128xf32> to vector<256x128xf32>
      %15 = arith.addf %12, %14 : vector<256x128xf32>
      %cst_14 = arith.constant 0.000000e+00 : f32
      %16 = vector.broadcast %cst_14 : f32 to vector<256x128xf32>
      %17 = arith.maximumf %15, %16 : vector<256x128xf32>
      %18 = arith.truncf %17 : vector<256x128xf32> to vector<256x128xbf16>
      %c0_15 = arith.constant 0 : index
      %c0_16 = arith.constant 0 : index
      %19 = vector.load %arg6[%c0_15, %c0_16] : memref<256x128xbf16, #tpu.memory_space<vmem>>, vector<256x128xbf16>
      tpu.vector_store %arg6[%c0_15, %c0_16], %18 {strides = array<i32>} : memref<256x128xbf16, #tpu.memory_space<vmem>>, vector<256x128xbf16>,
    } else {
    }
    return
  }
  func.func @transform_0(%arg0: i32, %arg1: i32, %arg2: i32) -> (i32, i32) {
    %c0_i32 = arith.constant 0 : i32
    return %arg0, %arg2 : i32, i32
  }
  func.func @transform_1(%arg0: i32, %arg1: i32, %arg2: i32) -> (i32, i32) {
    %c0_i32 = arith.constant 0 : i32
    return %arg2, %arg1 : i32, i32
  }
  func.func @transform_2(%arg0: i32, %arg1: i32, %arg2: i32) -> (i32, i32) {
    %c0_i32 = arith.constant 0 : i32
    %c0_i32_0 = arith.constant 0 : i32
    return %c0_i32, %arg1 : i32, i32
  }
  func.func @transform_3(%arg0: i32, %arg1: i32, %arg2: i32) -> (i32, i32) {
    %c0_i32 = arith.constant 0 : i32
    return %arg0, %arg1 : i32, i32
  }
}

module attributes {stable_mosaic.version = 11 : i64} {
  func.func @_mm_kernel(%arg0: i32, %arg1: i32, %arg2: i32, %arg3: memref<256x144xbf16, #tpu.memory_space<vmem>>, %arg4: memref<144x128xbf16, #tpu.memory_space<vmem>>, %arg5: memref<1x128xf32, #tpu.memory_space<vmem>>, %arg6: memref<256x128xbf16, #tpu.memory_space<vmem>>, %arg7: memref<256x128xf32, #tpu.memory_space<vmem>>) attributes {dimension_semantics = [#tpu.dimension_semantics<parallel>, #tpu.dimension_semantics<parallel>, #tpu.dimension_semantics<arbitrary>], iteration_bounds = array<i64: 2, 1, 1>, scalar_prefetch = 0 : i64, scratch_operands = 1 : i64, tpu.core_type = #tpu.core_type<tc>, window_params = [{transform_indices = @transform_0, window_bounds = array<i64: 256, 144>}, {transform_indices = @transform_1, window_bounds = array<i64: 144, 128>}, {transform_indices = @transform_2, window_bounds = array<i64: 1, 128>}, {transform_indices = @transform_3, window_bounds = array<i64: 256, 128>}]} {
    %c0_i32 = arith.constant 0 : i32
    %0 = arith.cmpi eq, %arg2, %c0_i32 : i32
    %1 = arith.extui %0 : i1 to i32
    %c0_i32_0 = arith.constant 0 : i32
    %2 = arith.cmpi ne, %1, %c0_i32_0 : i32
    scf.if %2 {
      %cst_10 = arith.constant 0.000000e+00 : f32
      %12 = vector.broadcast %cst_10 : f32 to vector<256x128xf32>
      %c0_11 = arith.constant 0 : index
      %c0_12 = arith.constant 0 : index
      %13 = vector.load %arg7[%c0_11, %c0_12] : memref<256x128xf32, #tpu.memory_space<vmem>>, vector<256x128xf32>
      tpu.vector_store %arg7[%c0_11, %c0_12], %12 {strides = array<i32>} : memref<256x128xf32, #tpu.memory_space<vmem>>, vector<256x128xf32>,
    } else {
    }
    %c0 = arith.constant 0 : index
    %c0_1 = arith.constant 0 : index
    %3 = vector.load %arg7[%c0, %c0_1] : memref<256x128xf32, #tpu.memory_space<vmem>>, vector<256x128xf32>
    %c0_2 = arith.constant 0 : index
    %c0_3 = arith.constant 0 : index
    %4 = vector.load %arg3[%c0_2, %c0_3] : memref<256x144xbf16, #tpu.memory_space<vmem>>, vector<256x144xbf16>
    %c0_4 = arith.constant 0 : index
    %c0_5 = arith.constant 0 : index
    %5 = vector.load %arg4[%c0_4, %c0_5] : memref<144x128xbf16, #tpu.memory_space<vmem>>, vector<144x128xbf16>
    %cst = arith.constant dense<0.000000e+00> : vector<256x128xf32>
    %6 = tpu.matmul %4, %5, %cst {dimension_numbers = #tpu.dot_dimension_numbers<[1], [0], [0], [1], [0, 0, 1, 1], [], []>} : vector<256x144xbf16>, vector<144x128xbf16>, vector<256x128xf32> -> vector<256x128xf32>
    %7 = arith.addf %3, %6 : vector<256x128xf32>
    %c0_6 = arith.constant 0 : index
    %c0_7 = arith.constant 0 : index
    %8 = vector.load %arg7[%c0_6, %c0_7] : memref<256x128xf32, #tpu.memory_space<vmem>>, vector<256x128xf32>
    tpu.vector_store %arg7[%c0_6, %c0_7], %7 {strides = array<i32>} : memref<256x128xf32, #tpu.memory_space<vmem>>, vector<256x128xf32>,
    %c0_i32_8 = arith.constant 0 : i32
    %9 = arith.cmpi eq, %arg2, %c0_i32_8 : i32
    %10 = arith.extui %9 : i1 to i32
    %c0_i32_9 = arith.constant 0 : i32
    %11 = arith.cmpi ne, %10, %c0_i32_9 : i32
    scf.if %11 {
      %c0_10 = arith.constant 0 : index
      %c0_11 = arith.constant 0 : index
      %12 = vector.load %arg7[%c0_10, %c0_11] : memref<256x128xf32, #tpu.memory_space<vmem>>, vector<256x128xf32>
      %c0_12 = arith.constant 0 : index
      %c0_13 = arith.constant 0 : index
      %13 = vector.load %arg5[%c0_12, %c0_13] : memref<1x128xf32, #tpu.memory_space<vmem>>, vector<1x128xf32>
      %14 = vector.broadcast %13 : vector<1x128xf32> to vector<256x128xf32>
      %15 = arith.addf %12, %14 : vector<256x128xf32>
      %cst_14 = arith.constant 0.000000e+00 : f32
      %16 = vector.broadcast %cst_14 : f32 to vector<256x128xf32>
      %17 = arith.maximumf %15, %16 : vector<256x128xf32>
      %18 = arith.truncf %17 : vector<256x128xf32> to vector<256x128xbf16>
      %c0_15 = arith.constant 0 : index
      %c0_16 = arith.constant 0 : index
      %19 = vector.load %arg6[%c0_15, %c0_16] : memref<256x128xbf16, #tpu.memory_space<vmem>>, vector<256x128xbf16>
      tpu.vector_store %arg6[%c0_15, %c0_16], %18 {strides = array<i32>} : memref<256x128xbf16, #tpu.memory_space<vmem>>, vector<256x128xbf16>,
    } else {
    }
    return
  }
  func.func @transform_0(%arg0: i32, %arg1: i32, %arg2: i32) -> (i32, i32) {
    %c0_i32 = arith.constant 0 : i32
    return %arg0, %arg2 : i32, i32
  }
  func.func @transform_1(%arg0: i32, %arg1: i32, %arg2: i32) -> (i32, i32) {
    %c0_i32 = arith.constant 0 : i32
    return %arg2, %arg1 : i32, i32
  }
  func.func @transform_2(%arg0: i32, %arg1: i32, %arg2: i32) -> (i32, i32) {
    %c0_i32 = arith.constant 0 : i32
    %c0_i32_0 = arith.constant 0 : i32
    return %c0_i32, %arg1 : i32, i32
  }
  func.func @transform_3(%arg0: i32, %arg1: i32, %arg2: i32) -> (i32, i32) {
    %c0_i32 = arith.constant 0 : i32
    return %arg0, %arg1 : i32, i32
  }
}

module attributes {stable_mosaic.version = 11 : i64} {
  func.func @_mm_kernel(%arg0: i32, %arg1: i32, %arg2: i32, %arg3: memref<256x32xbf16, #tpu.memory_space<vmem>>, %arg4: memref<32x128xbf16, #tpu.memory_space<vmem>>, %arg5: memref<1x128xf32, #tpu.memory_space<vmem>>, %arg6: memref<256x128xbf16, #tpu.memory_space<vmem>>, %arg7: memref<256x128xf32, #tpu.memory_space<vmem>>) attributes {dimension_semantics = [#tpu.dimension_semantics<parallel>, #tpu.dimension_semantics<parallel>, #tpu.dimension_semantics<arbitrary>], iteration_bounds = array<i64: 2, 1, 1>, scalar_prefetch = 0 : i64, scratch_operands = 1 : i64, tpu.core_type = #tpu.core_type<tc>, window_params = [{transform_indices = @transform_0, window_bounds = array<i64: 256, 32>}, {transform_indices = @transform_1, window_bounds = array<i64: 32, 128>}, {transform_indices = @transform_2, window_bounds = array<i64: 1, 128>}, {transform_indices = @transform_3, window_bounds = array<i64: 256, 128>}]} {
    %c0_i32 = arith.constant 0 : i32
    %0 = arith.cmpi eq, %arg2, %c0_i32 : i32
    %1 = arith.extui %0 : i1 to i32
    %c0_i32_0 = arith.constant 0 : i32
    %2 = arith.cmpi ne, %1, %c0_i32_0 : i32
    scf.if %2 {
      %cst_10 = arith.constant 0.000000e+00 : f32
      %12 = vector.broadcast %cst_10 : f32 to vector<256x128xf32>
      %c0_11 = arith.constant 0 : index
      %c0_12 = arith.constant 0 : index
      %13 = vector.load %arg7[%c0_11, %c0_12] : memref<256x128xf32, #tpu.memory_space<vmem>>, vector<256x128xf32>
      tpu.vector_store %arg7[%c0_11, %c0_12], %12 {strides = array<i32>} : memref<256x128xf32, #tpu.memory_space<vmem>>, vector<256x128xf32>,
    } else {
    }
    %c0 = arith.constant 0 : index
    %c0_1 = arith.constant 0 : index
    %3 = vector.load %arg7[%c0, %c0_1] : memref<256x128xf32, #tpu.memory_space<vmem>>, vector<256x128xf32>
    %c0_2 = arith.constant 0 : index
    %c0_3 = arith.constant 0 : index
    %4 = vector.load %arg3[%c0_2, %c0_3] : memref<256x32xbf16, #tpu.memory_space<vmem>>, vector<256x32xbf16>
    %c0_4 = arith.constant 0 : index
    %c0_5 = arith.constant 0 : index
    %5 = vector.load %arg4[%c0_4, %c0_5] : memref<32x128xbf16, #tpu.memory_space<vmem>>, vector<32x128xbf16>
    %cst = arith.constant dense<0.000000e+00> : vector<256x128xf32>
    %6 = tpu.matmul %4, %5, %cst {dimension_numbers = #tpu.dot_dimension_numbers<[1], [0], [0], [1], [0, 0, 1, 1], [], []>} : vector<256x32xbf16>, vector<32x128xbf16>, vector<256x128xf32> -> vector<256x128xf32>
    %7 = arith.addf %3, %6 : vector<256x128xf32>
    %c0_6 = arith.constant 0 : index
    %c0_7 = arith.constant 0 : index
    %8 = vector.load %arg7[%c0_6, %c0_7] : memref<256x128xf32, #tpu.memory_space<vmem>>, vector<256x128xf32>
    tpu.vector_store %arg7[%c0_6, %c0_7], %7 {strides = array<i32>} : memref<256x128xf32, #tpu.memory_space<vmem>>, vector<256x128xf32>,
    %c0_i32_8 = arith.constant 0 : i32
    %9 = arith.cmpi eq, %arg2, %c0_i32_8 : i32
    %10 = arith.extui %9 : i1 to i32
    %c0_i32_9 = arith.constant 0 : i32
    %11 = arith.cmpi ne, %10, %c0_i32_9 : i32
    scf.if %11 {
      %c0_10 = arith.constant 0 : index
      %c0_11 = arith.constant 0 : index
      %12 = vector.load %arg7[%c0_10, %c0_11] : memref<256x128xf32, #tpu.memory_space<vmem>>, vector<256x128xf32>
      %c0_12 = arith.constant 0 : index
      %c0_13 = arith.constant 0 : index
      %13 = vector.load %arg5[%c0_12, %c0_13] : memref<1x128xf32, #tpu.memory_space<vmem>>, vector<1x128xf32>
      %14 = vector.broadcast %13 : vector<1x128xf32> to vector<256x128xf32>
      %15 = arith.addf %12, %14 : vector<256x128xf32>
      %16 = arith.truncf %15 : vector<256x128xf32> to vector<256x128xbf16>
      %c0_14 = arith.constant 0 : index
      %c0_15 = arith.constant 0 : index
      %17 = vector.load %arg6[%c0_14, %c0_15] : memref<256x128xbf16, #tpu.memory_space<vmem>>, vector<256x128xbf16>
      tpu.vector_store %arg6[%c0_14, %c0_15], %16 {strides = array<i32>} : memref<256x128xbf16, #tpu.memory_space<vmem>>, vector<256x128xbf16>,
    } else {
    }
    return
  }
  func.func @transform_0(%arg0: i32, %arg1: i32, %arg2: i32) -> (i32, i32) {
    %c0_i32 = arith.constant 0 : i32
    return %arg0, %arg2 : i32, i32
  }
  func.func @transform_1(%arg0: i32, %arg1: i32, %arg2: i32) -> (i32, i32) {
    %c0_i32 = arith.constant 0 : i32
    return %arg2, %arg1 : i32, i32
  }
  func.func @transform_2(%arg0: i32, %arg1: i32, %arg2: i32) -> (i32, i32) {
    %c0_i32 = arith.constant 0 : i32
    %c0_i32_0 = arith.constant 0 : i32
    return %c0_i32, %arg1 : i32, i32
  }
  func.func @transform_3(%arg0: i32, %arg1: i32, %arg2: i32) -> (i32, i32) {
    %c0_i32 = arith.constant 0 : i32
    return %arg0, %arg1 : i32, i32
  }
}

module attributes {stable_mosaic.version = 11 : i64} {
  func.func @_mm_res_kernel(%arg0: i32, %arg1: i32, %arg2: i32, %arg3: memref<256x16xbf16, #tpu.memory_space<vmem>>, %arg4: memref<16x128xbf16, #tpu.memory_space<vmem>>, %arg5: memref<1x128xf32, #tpu.memory_space<vmem>>, %arg6: memref<256x128xbf16, #tpu.memory_space<vmem>>, %arg7: memref<256x128xf32, #tpu.memory_space<vmem>>, %arg8: memref<256x128xf32, #tpu.memory_space<vmem>>) attributes {dimension_semantics = [#tpu.dimension_semantics<parallel>, #tpu.dimension_semantics<parallel>, #tpu.dimension_semantics<arbitrary>], iteration_bounds = array<i64: 2, 1, 1>, scalar_prefetch = 0 : i64, scratch_operands = 1 : i64, tpu.core_type = #tpu.core_type<tc>, window_params = [{transform_indices = @transform_0, window_bounds = array<i64: 256, 16>}, {transform_indices = @transform_1, window_bounds = array<i64: 16, 128>}, {transform_indices = @transform_2, window_bounds = array<i64: 1, 128>}, {transform_indices = @transform_3, window_bounds = array<i64: 256, 128>}, {transform_indices = @transform_4, window_bounds = array<i64: 256, 128>}]} {
    %c0_i32 = arith.constant 0 : i32
    %0 = arith.cmpi eq, %arg2, %c0_i32 : i32
    %1 = arith.extui %0 : i1 to i32
    %c0_i32_0 = arith.constant 0 : i32
    %2 = arith.cmpi ne, %1, %c0_i32_0 : i32
    scf.if %2 {
      %cst_10 = arith.constant 0.000000e+00 : f32
      %12 = vector.broadcast %cst_10 : f32 to vector<256x128xf32>
      %c0_11 = arith.constant 0 : index
      %c0_12 = arith.constant 0 : index
      %13 = vector.load %arg8[%c0_11, %c0_12] : memref<256x128xf32, #tpu.memory_space<vmem>>, vector<256x128xf32>
      tpu.vector_store %arg8[%c0_11, %c0_12], %12 {strides = array<i32>} : memref<256x128xf32, #tpu.memory_space<vmem>>, vector<256x128xf32>,
    } else {
    }
    %c0 = arith.constant 0 : index
    %c0_1 = arith.constant 0 : index
    %3 = vector.load %arg8[%c0, %c0_1] : memref<256x128xf32, #tpu.memory_space<vmem>>, vector<256x128xf32>
    %c0_2 = arith.constant 0 : index
    %c0_3 = arith.constant 0 : index
    %4 = vector.load %arg3[%c0_2, %c0_3] : memref<256x16xbf16, #tpu.memory_space<vmem>>, vector<256x16xbf16>
    %c0_4 = arith.constant 0 : index
    %c0_5 = arith.constant 0 : index
    %5 = vector.load %arg4[%c0_4, %c0_5] : memref<16x128xbf16, #tpu.memory_space<vmem>>, vector<16x128xbf16>
    %cst = arith.constant dense<0.000000e+00> : vector<256x128xf32>
    %6 = tpu.matmul %4, %5, %cst {dimension_numbers = #tpu.dot_dimension_numbers<[1], [0], [0], [1], [0, 0, 1, 1], [], []>} : vector<256x16xbf16>, vector<16x128xbf16>, vector<256x128xf32> -> vector<256x128xf32>
    %7 = arith.addf %3, %6 : vector<256x128xf32>
    %c0_6 = arith.constant 0 : index
    %c0_7 = arith.constant 0 : index
    %8 = vector.load %arg8[%c0_6, %c0_7] : memref<256x128xf32, #tpu.memory_space<vmem>>, vector<256x128xf32>
    tpu.vector_store %arg8[%c0_6, %c0_7], %7 {strides = array<i32>} : memref<256x128xf32, #tpu.memory_space<vmem>>, vector<256x128xf32>,
    %c0_i32_8 = arith.constant 0 : i32
    %9 = arith.cmpi eq, %arg2, %c0_i32_8 : i32
    %10 = arith.extui %9 : i1 to i32
    %c0_i32_9 = arith.constant 0 : i32
    %11 = arith.cmpi ne, %10, %c0_i32_9 : i32
    scf.if %11 {
      %c0_10 = arith.constant 0 : index
      %c0_11 = arith.constant 0 : index
      %12 = vector.load %arg8[%c0_10, %c0_11] : memref<256x128xf32, #tpu.memory_space<vmem>>, vector<256x128xf32>
      %c0_12 = arith.constant 0 : index
      %c0_13 = arith.constant 0 : index
      %13 = vector.load %arg5[%c0_12, %c0_13] : memref<1x128xf32, #tpu.memory_space<vmem>>, vector<1x128xf32>
      %14 = vector.broadcast %13 : vector<1x128xf32> to vector<256x128xf32>
      %15 = arith.addf %12, %14 : vector<256x128xf32>
      %c0_14 = arith.constant 0 : index
      %c0_15 = arith.constant 0 : index
      %16 = vector.load %arg6[%c0_14, %c0_15] : memref<256x128xbf16, #tpu.memory_space<vmem>>, vector<256x128xbf16>
      %17 = arith.extf %16 : vector<256x128xbf16> to vector<256x128xf32>
      %18 = arith.addf %15, %17 : vector<256x128xf32>
      %cst_16 = arith.constant 0.000000e+00 : f32
      %19 = vector.broadcast %cst_16 : f32 to vector<256x128xf32>
      %20 = arith.maximumf %18, %19 : vector<256x128xf32>
      %c0_17 = arith.constant 0 : index
      %c0_18 = arith.constant 0 : index
      %21 = vector.load %arg7[%c0_17, %c0_18] : memref<256x128xf32, #tpu.memory_space<vmem>>, vector<256x128xf32>
      tpu.vector_store %arg7[%c0_17, %c0_18], %20 {strides = array<i32>} : memref<256x128xf32, #tpu.memory_space<vmem>>, vector<256x128xf32>,
    } else {
    }
    return
  }
  func.func @transform_0(%arg0: i32, %arg1: i32, %arg2: i32) -> (i32, i32) {
    %c0_i32 = arith.constant 0 : i32
    return %arg0, %arg2 : i32, i32
  }
  func.func @transform_1(%arg0: i32, %arg1: i32, %arg2: i32) -> (i32, i32) {
    %c0_i32 = arith.constant 0 : i32
    return %arg2, %arg1 : i32, i32
  }
  func.func @transform_2(%arg0: i32, %arg1: i32, %arg2: i32) -> (i32, i32) {
    %c0_i32 = arith.constant 0 : i32
    %c0_i32_0 = arith.constant 0 : i32
    return %c0_i32, %arg1 : i32, i32
  }
  func.func @transform_3(%arg0: i32, %arg1: i32, %arg2: i32) -> (i32, i32) {
    %c0_i32 = arith.constant 0 : i32
    return %arg0, %arg1 : i32, i32
  }
  func.func @transform_4(%arg0: i32, %arg1: i32, %arg2: i32) -> (i32, i32) {
    %c0_i32 = arith.constant 0 : i32
    return %arg0, %arg1 : i32, i32
  }
}

</mosaic_0001>

<bundles_post_ra>
// kernel: _lambda_.4
= control target key start
LH: loop header
LB: loop body
LE: loop exit
PB: predicated region body
PF: predicated region fallthrough
CT: control target
= control target key end

     0   :  { %s1458_s12 = smov 0   ;;  %s1460_s13 = smov 0   ;;  %s1593_s0 = inlined_call_operand.vmem [shape: bf16[512,32], index: 0, kind: input, shape index: {}]   ;;  %s1594_s1 = inlined_call_operand.vmem [shape: bf16[32,128], index: 1, kind: input, shape index: {}]   ;;  %s1595_s2 = inlined_call_operand.vmem [shape: f32[1,128], index: 2, kind: input, shape index: {}]   ;;  %s1596_s3 = inlined_call_operand.vmem [shape: bf16[512,128], index: 3, kind: output, shape index: {}]  }
   0x1   :  { %s1462_s14 = smov 0  }
   0x2 LB: > { %s32_s15 = sadd.s32 1, %s1432_s13  ;;  %p1113_p0 = scmp.ge.s32.totalorder %s1436_s14, 1  ;;  %s1436_s14 = sphi %s1462_s14, %s13_s14   ;;  %s1432_s13 = sphi %s1460_s13, %s1598_s13   ;;  %s1428_s12 = sphi %s1458_s12, %s1597_s12  }
   0x3   : > { %p34_p1 = scmp.ge.s32.totalorder %s32_s15, 2  ;;  %p188_p2 = scmp.lt.s32.totalorder %s1436_s14, 3 }
   0x5   : > { %s1600_s15 = smov (%p34_p1, %s32_s15), 0  ;;  %p189_p3 = pnand %p1113_p0, %p188_p2 }
   0x6   : > { %v1396_v0 = vld [vmem:[%s1594_s1] sm:$0xff] (!%p189_p3)   ;;  %s1114_s18 = sshll.u32 (!%p189_p3), %s1428_s12, 5  ;;  %v1397_v1 = vld [vmem:[%s1594_s1 + $0x8] sm:$0xff] (!%p189_p3)   ;;  %vm456_vm0 = vcmask (!%p189_p3), 261120  }
   0x7   : > { %192 = sbr.rel (%p189_p3) target bundleno = 266 (0x10a), region = 32  ;;  %p230_p4 = scmp.lt.s32.totalorder (!%p189_p3), %s1114_s18, 63  ;;  %1332 = vmatprep.subr.bf16.mxu0 (!%p189_p3), %v1396_v0  ;;  %1368 = vmatprep.subr.bf16.mxu1 (!%p189_p3), %v1396_v0  ;;  %v1527_v18 = vld [vmem:[%s1595_s2] ss:$0 sm:$0xff] (!%p189_p3) }
   0x8   : > { %1333 = vmatpush3.bf16.msra.mxu0 (!%p189_p3), %v1396_v0  ;;  %1370 = vmatpush3.bf16.msra.mxu1 (!%p189_p3), %v1396_v0 }
   0x9   : > { %1334 = vmatprep.subr.bf16.mxu0 (!%p189_p3), %v1397_v1  ;;  %1369 = vmatprep.subr.bf16.mxu1 (!%p189_p3), %v1397_v1 }
   0xc   : > { %1335 = vmatpush3.bf16.msra.mxu0 (!%p189_p3), %v1397_v1  ;;  %1371 = vmatpush3.bf16.msra.mxu1 (!%p189_p3), %v1397_v1 }
   0xe   : > { %s1602_s18 = smov (!%p230_p4, %s1114_s18), 63 }
   0xf   : > { %s1115_s21 = sshll.u32 %s1602_s18, 2 }
  0x10   : > { %s1490_s24 = scalar_lea.vmem %s1593_s0, %s1115_s21  ;;  %s1542_s29 = scalar_lea.vmem %s1596_s3, %s1115_s21 }
  0x11   : > { %v1398_v2 = vld [vmem:[%s1490_s24] sm:$0xff]   ;;  %v1400_v4 = vld [vmem:[%s1490_s24 + $0x8] sm:$0xff]   ;;  %v1402_v6 = vld [vmem:[%s1490_s24 + $0x10] sm:$0xff]  }
  0x12   : > { %v1399_v3 = vld [vmem:[%s1490_s24 + $0x40] sm:$0xff]   ;;  %1336 = vmatprep.mubr.msk.bf16.mxu0 %vm456_vm0, %v1398_v2  ;;  %v1401_v5 = vld [vmem:[%s1490_s24 + $0x48] sm:$0xff]   ;;  %v1403_v7 = vld [vmem:[%s1490_s24 + $0x50] sm:$0xff]  }
  0x13   : > { %1352 = vmatprep.mubr.msk.bf16.mxu1 %vm456_vm0, %v1399_v3  ;;  %1337 = vmatmul.mubr.msk.bf16.vlgmr.msra.gmra.mrb[0].mxu0 %vm456_vm0, %v1400_v4  ;;  %v1404_v8 = vld [vmem:[%s1490_s24 + $0x18] sm:$0xff]   ;;  %v1406_v10 = vld [vmem:[%s1490_s24 + $0x20] sm:$0xff]   ;;  %v1408_v12 = vld [vmem:[%s1490_s24 + $0x28] sm:$0xff]  }
  0x14   : > { %1353 = vmatmul.mubr.msk.bf16.vlgmr.msra.gmra.mrb[0].mxu1 %vm456_vm0, %v1401_v5  ;;  %1340 = vmatprep.mubr.msk.bf16.mxu0 %vm456_vm0, %v1402_v6  ;;  %v1405_v9 = vld [vmem:[%s1490_s24 + $0x58] sm:$0xff]   ;;  %v1407_v11 = vld [vmem:[%s1490_s24 + $0x60] sm:$0xff]   ;;  %v1409_v13 = vld [vmem:[%s1490_s24 + $0x68] sm:$0xff]  }
  0x15   : > { %1356 = vmatprep.mubr.msk.bf16.mxu1 %vm456_vm0, %v1403_v7  ;;  %v1410_v14 = vld [vmem:[%s1490_s24 + $0x30] sm:$0xff]   ;;  %v1412_v16 = vld [vmem:[%s1490_s24 + $0x38] sm:$0xff]  }
  0x16   : > { %v1411_v15 = vld [vmem:[%s1490_s24 + $0x70] sm:$0xff]   ;;  %v1413_v17 = vld [vmem:[%s1490_s24 + $0x78] sm:$0xff]  }
  0x1b   : > { %1341 = vmatmul.mubr.msk.bf16.gmra.mrb[4].mxu0 %vm456_vm0, %v1404_v8 }
  0x1c   : > { %1357 = vmatmul.mubr.msk.bf16.gmra.mrb[4].mxu1 %vm456_vm0, %v1405_v9  ;;  %1344 = vmatprep.mubr.msk.bf16.mxu0 %vm456_vm0, %v1406_v10 }
  0x1d   : > { %1360 = vmatprep.mubr.msk.bf16.mxu1 %vm456_vm0, %v1407_v11 }
  0x23   : > { %1345 = vmatmul.mubr.msk.bf16.gmra.mrb[8].mxu0 %vm456_vm0, %v1408_v12 }
  0x24   : > { %1361 = vmatmul.mubr.msk.bf16.gmra.mrb[8].mxu1 %vm456_vm0, %v1409_v13  ;;  %1348 = vmatprep.mubr.msk.bf16.mxu0 %vm456_vm0, %v1410_v14 }
  0x25   : > { %1364 = vmatprep.mubr.msk.bf16.mxu1 %vm456_vm0, %v1411_v15 }
  0x2b   : > { %1349 = vmatmul.mubr.msk.bf16.gmra.mrb[12].mxu0 %vm456_vm0, %v1412_v16 }
  0x2c   : > { %1365 = vmatmul.mubr.msk.bf16.gmra.mrb[12].mxu1 %vm456_vm0, %v1413_v17 }
  0xe6   : > { %v1338_v19 = vpop.f32.mrb[0].mxu0 }
  0xe7   : > { %v774_v20 = vadd.f32 %v1338_v19, %v1527_v18  ;;  %v1354_v21 = vpop.f32.mrb[0].mxu1  ;;  %v539_v22 = vpop.f32.mrb[1].mxu0 }
  0xe8   : > { %v790_v23 = vadd.f32 %v1354_v21, %v1527_v18  ;;  %v772_v24 = vadd.f32 %v1527_v18, %v539_v22  ;;  %v603_v25 = vpop.f32.mrb[1].mxu1  ;;  %v1339_v26 = vpop.f32.mrb[2].mxu0 }
  0xe9   : > { %v788_v27 = vadd.f32 %v1527_v18, %v603_v25  ;;  %v775_v28 = vadd.f32 %v1339_v26, %v1527_v18  ;;  %v1355_v29 = vpop.f32.mrb[2].mxu1  ;;  %v542_v30 = vpop.f32.mrb[3].mxu0  ;;  %v806_v34 = vmax.f32 %v774_v20, 0.0 }
  0xea   : > { %v791_v31 = vadd.f32 %v1355_v29, %v1527_v18  ;;  %v773_v32 = vadd.f32 %v1527_v18, %v542_v30  ;;  %v606_v33 = vpop.f32.mrb[3].mxu1  ;;  %v822_v37 = vmax.f32 %v790_v23, 0.0  ;;  %v804_v38 = vmax.f32 %v772_v24, 0.0 }
  0xeb   : > { %v807_v35 = vmax.f32 %v775_v28, 0.0  ;;  %v789_v36 = vadd.f32 %v1527_v18, %v606_v33  ;;  %v820_v41 = vmax.f32 %v788_v27, 0.0 }
  0xec   : > { %v823_v39 = vmax.f32 %v791_v31, 0.0  ;;  %v805_v40 = vmax.f32 %v773_v32, 0.0 }
  0xed   : > { %v1227_v42 = vpack.c.bf16 %v807_v35, %v806_v34  ;;  %v821_v43 = vmax.f32 %v789_v36, 0.0 }
  0xee   : > { %v1267_v44 = vpack.c.bf16 %v823_v39, %v822_v37  ;;  %v1222_v45 = vpack.c.bf16 %v805_v40, %v804_v38  ;;  %v1342_v46 = vpop.f32.mrb[4].mxu0 }
  0xef   : > { %1299 = vst [vmem:[%s1542_s29 + $0x8] sm:$0xff] %v1227_v42   ;;  %v1262_v47 = vpack.c.bf16 %v821_v43, %v820_v41  ;;  %v778_v48 = vadd.f32 %v1342_v46, %v1527_v18  ;;  %v1358_v49 = vpop.f32.mrb[4].mxu1  ;;  %v555_v50 = vpop.f32.mrb[5].mxu0 }
  0xf0   : > { %1307 = vst [vmem:[%s1542_s29 + $0x48] sm:$0xff] %v1267_v44   ;;  %1223 = vst [vmem:[%s1542_s29] sm:$0xff] %v1222_v45   ;;  %v794_v51 = vadd.f32 %v1358_v49, %v1527_v18  ;;  %v776_v52 = vadd.f32 %v1527_v18, %v555_v50  ;;  %v619_v53 = vpop.f32.mrb[5].mxu1  ;;  %v1343_v54 = vpop.f32.mrb[6].mxu0 }
  0xf1   : > { %1306 = vst [vmem:[%s1542_s29 + $0x40] sm:$0xff] %v1262_v47   ;;  %v792_v55 = vadd.f32 %v1527_v18, %v619_v53  ;;  %v779_v56 = vadd.f32 %v1343_v54, %v1527_v18  ;;  %v1359_v57 = vpop.f32.mrb[6].mxu1  ;;  %v558_v58 = vpop.f32.mrb[7].mxu0  ;;  %v810_v62 = vmax.f32 %v778_v48, 0.0 }
  0xf2   : > { %v795_v59 = vadd.f32 %v1359_v57, %v1527_v18  ;;  %v777_v60 = vadd.f32 %v1527_v18, %v558_v58  ;;  %v622_v61 = vpop.f32.mrb[7].mxu1  ;;  %v826_v1 = vmax.f32 %v794_v51, 0.0  ;;  %v808_v2 = vmax.f32 %v776_v52, 0.0 }
  0xf3   : > { %v811_v63 = vmax.f32 %v779_v56, 0.0  ;;  %v793_v0 = vadd.f32 %v1527_v18, %v622_v61  ;;  %v824_v5 = vmax.f32 %v792_v55, 0.0 }
  0xf4   : > { %v827_v3 = vmax.f32 %v795_v59, 0.0  ;;  %v809_v4 = vmax.f32 %v777_v60, 0.0 }
  0xf5   : > { %v1237_v6 = vpack.c.bf16 %v811_v63, %v810_v62  ;;  %v825_v7 = vmax.f32 %v793_v0, 0.0 }
  0xf6   : > { %v1277_v8 = vpack.c.bf16 %v827_v3, %v826_v1  ;;  %v1232_v9 = vpack.c.bf16 %v809_v4, %v808_v2  ;;  %v1346_v10 = vpop.f32.mrb[8].mxu0 }
  0xf7   : > { %1301 = vst [vmem:[%s1542_s29 + $0x18] sm:$0xff] %v1237_v6   ;;  %v1272_v11 = vpack.c.bf16 %v825_v7, %v824_v5  ;;  %v782_v12 = vadd.f32 %v1346_v10, %v1527_v18  ;;  %v1362_v13 = vpop.f32.mrb[8].mxu1  ;;  %v571_v14 = vpop.f32.mrb[9].mxu0 }
  0xf8   : > { %1309 = vst [vmem:[%s1542_s29 + $0x58] sm:$0xff] %v1277_v8   ;;  %1300 = vst [vmem:[%s1542_s29 + $0x10] sm:$0xff] %v1232_v9   ;;  %v798_v15 = vadd.f32 %v1362_v13, %v1527_v18  ;;  %v780_v16 = vadd.f32 %v1527_v18, %v571_v14  ;;  %v635_v17 = vpop.f32.mrb[9].mxu1  ;;  %v1347_v19 = vpop.f32.mrb[10].mxu0 }
  0xf9   : > { %1308 = vst [vmem:[%s1542_s29 + $0x50] sm:$0xff] %v1272_v11   ;;  %v796_v20 = vadd.f32 %v1527_v18, %v635_v17  ;;  %v783_v21 = vadd.f32 %v1347_v19, %v1527_v18  ;;  %v1363_v22 = vpop.f32.mrb[10].mxu1  ;;  %v574_v23 = vpop.f32.mrb[11].mxu0  ;;  %v814_v27 = vmax.f32 %v782_v12, 0.0 }
  0xfa   : > { %v799_v24 = vadd.f32 %v1363_v22, %v1527_v18  ;;  %v781_v25 = vadd.f32 %v1527_v18, %v574_v23  ;;  %v638_v26 = vpop.f32.mrb[11].mxu1  ;;  %v830_v30 = vmax.f32 %v798_v15, 0.0  ;;  %v812_v31 = vmax.f32 %v780_v16, 0.0 }
  0xfb   : > { %v815_v28 = vmax.f32 %v783_v21, 0.0  ;;  %v797_v29 = vadd.f32 %v1527_v18, %v638_v26  ;;  %v828_v34 = vmax.f32 %v796_v20, 0.0 }
  0xfc   : > { %v831_v32 = vmax.f32 %v799_v24, 0.0  ;;  %v813_v33 = vmax.f32 %v781_v25, 0.0 }
  0xfd   : > { %v1247_v35 = vpack.c.bf16 %v815_v28, %v814_v27  ;;  %v829_v36 = vmax.f32 %v797_v29, 0.0 }
  0xfe   : > { %v1287_v37 = vpack.c.bf16 %v831_v32, %v830_v30  ;;  %v1242_v38 = vpack.c.bf16 %v813_v33, %v812_v31  ;;  %v1350_v39 = vpop.f32.mrb[12].mxu0 }
  0xff   : > { %1303 = vst [vmem:[%s1542_s29 + $0x28] sm:$0xff] %v1247_v35   ;;  %v1282_v40 = vpack.c.bf16 %v829_v36, %v828_v34  ;;  %v786_v41 = vadd.f32 %v1350_v39, %v1527_v18  ;;  %v1366_v42 = vpop.f32.mrb[12].mxu1  ;;  %v587_v43 = vpop.f32.mrb[13].mxu0 }
 0x100   : > { %1311 = vst [vmem:[%s1542_s29 + $0x68] sm:$0xff] %v1287_v37   ;;  %1302 = vst [vmem:[%s1542_s29 + $0x20] sm:$0xff] %v1242_v38   ;;  %v802_v44 = vadd.f32 %v1366_v42, %v1527_v18  ;;  %v784_v45 = vadd.f32 %v1527_v18, %v587_v43  ;;  %v651_v46 = vpop.f32.mrb[13].mxu1  ;;  %v1351_v47 = vpop.f32.mrb[14].mxu0 }
 0x101   : > { %1310 = vst [vmem:[%s1542_s29 + $0x60] sm:$0xff] %v1282_v40   ;;  %v800_v48 = vadd.f32 %v1527_v18, %v651_v46  ;;  %v787_v49 = vadd.f32 %v1351_v47, %v1527_v18  ;;  %v1367_v50 = vpop.f32.mrb[14].mxu1  ;;  %v590_v51 = vpop.f32.mrb[15].mxu0  ;;  %v818_v55 = vmax.f32 %v786_v41, 0.0 }
 0x102   : > { %v803_v52 = vadd.f32 %v1367_v50, %v1527_v18  ;;  %v785_v53 = vadd.f32 %v1527_v18, %v590_v51  ;;  %v654_v54 = vpop.f32.mrb[15].mxu1  ;;  %v834_v58 = vmax.f32 %v802_v44, 0.0  ;;  %v816_v59 = vmax.f32 %v784_v45, 0.0 }
 0x103   : > { %v819_v56 = vmax.f32 %v787_v49, 0.0  ;;  %v801_v57 = vadd.f32 %v1527_v18, %v654_v54  ;;  %v832_v62 = vmax.f32 %v800_v48, 0.0 }
 0x104   : > { %v835_v60 = vmax.f32 %v803_v52, 0.0  ;;  %v817_v61 = vmax.f32 %v785_v53, 0.0 }
 0x105   : > { %v1257_v63 = vpack.c.bf16 %v819_v56, %v818_v55  ;;  %v833_v0 = vmax.f32 %v801_v57, 0.0 }
 0x106   : > { %v1297_v1 = vpack.c.bf16 %v835_v60, %v834_v58  ;;  %v1252_v2 = vpack.c.bf16 %v817_v61, %v816_v59 }
 0x107   : > { %1305 = vst [vmem:[%s1542_s29 + $0x38] sm:$0xff] %v1257_v63   ;;  %v1292_v3 = vpack.c.bf16 %v833_v0, %v832_v62 }
 0x108   : > { %1313 = vst [vmem:[%s1542_s29 + $0x78] sm:$0xff] %v1297_v1   ;;  %1304 = vst [vmem:[%s1542_s29 + $0x30] sm:$0xff] %v1252_v2  }
 0x109   : > { %1312 = vst [vmem:[%s1542_s29 + $0x70] sm:$0xff] %v1292_v3  }
 0x10a PF: > { %s13_s14 = sadd.s32 1, %s1436_s14   ;;  %s1597_s12 = smov %s1432_s13 }
 0x10b   : > { %p10_p5 = scmp.ge.s32.totalorder %s13_s14, 4   ;;  %s1598_s13 = smov %s1600_s15 }
 0x10d   :  { %12 = sbr.rel (!%p10_p5) target bundleno = 2 (0x2), region = 76 }

// kernel: _lambda_.5
= control target key start
LH: loop header
LB: loop body
LE: loop exit
PB: predicated region body
PF: predicated region fallthrough
CT: control target
= control target key end

     0   :  { %s1615_s12 = smov 0   ;;  %s1617_s13 = smov 0   ;;  %s1784_s0 = inlined_call_operand.vmem [shape: bf16[512,144], index: 0, kind: input, shape index: {}]   ;;  %s1785_s1 = inlined_call_operand.vmem [shape: bf16[144,128], index: 1, kind: input, shape index: {}]   ;;  %s1786_s2 = inlined_call_operand.vmem [shape: f32[1,128], index: 2, kind: input, shape index: {}]   ;;  %s1787_s3 = inlined_call_operand.vmem [shape: bf16[512,128], index: 3, kind: output, shape index: {}]  }
   0x1   :  { %s1619_s14 = smov 0  }
   0x2 LB: > { %s32_s15 = sadd.s32 1, %s1588_s13  ;;  %p1244_p0 = scmp.ge.s32.totalorder %s1592_s14, 1  ;;  %s1592_s14 = sphi %s1619_s14, %s13_s14   ;;  %s1588_s13 = sphi %s1617_s13, %s1789_s13   ;;  %s1584_s12 = sphi %s1615_s12, %s1788_s12  }
   0x3   : > { %p34_p1 = scmp.ge.s32.totalorder %s32_s15, 2  ;;  %p191_p2 = scmp.lt.s32.totalorder %s1592_s14, 3 }
   0x5   : > { %s1791_s15 = smov (%p34_p1, %s32_s15), 0  ;;  %p192_p3 = pnand %p1244_p0, %p191_p2 }
   0x6   : > { %v1513_v0 = vld [vmem:[%s1785_s1] sm:$0xff] (!%p192_p3)   ;;  %v1594_v1 = vmov (!%p192_p3), 0   ;;  %s1245_s18 = sshll.u32 (!%p192_p3), %s1584_s12, 5  ;;  %v1514_v2 = vld [vmem:[%s1785_s1 + $0x8] sm:$0xff] (!%p192_p3)   ;;  %v1515_v3 = vld [vmem:[%s1785_s1 + $0x10] sm:$0xff] (!%p192_p3)   ;;  %vm584_vm0 = vcmask (!%p192_p3), 130048  }
   0x7   : > { %195 = sbr.rel (%p192_p3) target bundleno = 320 (0x140), region = 32  ;;  %633 = vmatprep.subr.bf16.mxu0 (!%p192_p3), %v1594_v1  ;;  %1470 = vmatprep.subr.bf16.mxu1 (!%p192_p3), %v1594_v1  ;;  %p236_p4 = scmp.lt.s32.totalorder (!%p192_p3), %s1245_s18, 63  ;;  %v1516_v4 = vld [vmem:[%s1785_s1 + $0x18] sm:$0xff] (!%p192_p3)   ;;  %v1517_v7 = vld [vmem:[%s1785_s1 + $0x20] sm:$0xff] (!%p192_p3)   ;;  %v1518_v8 = vld [vmem:[%s1785_s1 + $0x28] sm:$0xff] (!%p192_p3)  }
   0x8   : > { %634 = vmatpush1.bf16.msra.mxu0 (!%p192_p3), %v1513_v0  ;;  %1479 = vmatpush1.bf16.msra.mxu1 (!%p192_p3), %v1513_v0  ;;  %v1519_v9 = vld [vmem:[%s1785_s1 + $0x30] sm:$0xff] (!%p192_p3)   ;;  %v1520_v10 = vld [vmem:[%s1785_s1 + $0x38] sm:$0xff] (!%p192_p3)   ;;  %v1521_v11 = vld [vmem:[%s1785_s1 + $0x40] sm:$0xff] (!%p192_p3)  }
   0x9   : > { %635 = vmatprep.subr.bf16.mxu0 (!%p192_p3), %v1594_v1  ;;  %1471 = vmatprep.subr.bf16.mxu1 (!%p192_p3), %v1594_v1  ;;  %v1719_v42 = vld [vmem:[%s1786_s2] ss:$0 sm:$0xff] (!%p192_p3) }
   0xc   : > { %636 = vmatpush1.bf16.msra.mxu0 (!%p192_p3), %v1514_v2  ;;  %1480 = vmatpush1.bf16.msra.mxu1 (!%p192_p3), %v1514_v2 }
   0xd   : > { %637 = vmatprep.subr.bf16.mxu0 (!%p192_p3), %v1594_v1  ;;  %1472 = vmatprep.subr.bf16.mxu1 (!%p192_p3), %v1594_v1 }
   0xe   : > { %s1793_s18 = smov (!%p236_p4, %s1245_s18), 63 }
   0xf   : > { %s1342_s23 = sshll.u32 %s1793_s18, 3  ;;  %s1249_s17 = sshll.u32 %s1793_s18, 2 }
  0x10   : > { %s1648_s26 = scalar_lea.vmem %s1784_s0, %s1342_s23  ;;  %638 = vmatpush1.bf16.msra.mxu0 %v1515_v3  ;;  %1481 = vmatpush1.bf16.msra.mxu1 %v1515_v3  ;;  %s1729_s21 = scalar_lea.vmem %s1787_s3, %s1249_s17 }
  0x11   : > { %v1524_v5 = vld [vmem:[%s1648_s26 + $0x4] ss:$8 sps:$4 sm:$0xff]   ;;  %639 = vmatprep.subr.bf16.mxu0 %v1594_v1  ;;  %1473 = vmatprep.subr.bf16.mxu1 %v1594_v1  ;;  %v1522_v12 = vld [vmem:[%s1648_s26] ss:$8 sps:$4 sm:$0xff]   ;;  %v1528_v14 = vld [vmem:[%s1648_s26 + $0x14] ss:$8 sps:$4 sm:$0xff]  }
  0x12   : > { %v1527_v6 = vld [vmem:[%s1648_s26 + $0x84] ss:$8 sps:$4 sm:$0xff]   ;;  %1291 = vmatprep.mubr.msk.bf16.mxu0 %vm584_vm0, %v1524_v5  ;;  %v1525_v13 = vld [vmem:[%s1648_s26 + $0x80] ss:$8 sps:$4 sm:$0xff]   ;;  %v1530_v15 = vld [vmem:[%s1648_s26 + $0x94] ss:$8 sps:$4 sm:$0xff]  }
  0x13   : > { %1299 = vmatprep.mubr.msk.bf16.mxu1 %vm584_vm0, %v1527_v6  ;;  %v1532_v16 = vld [vmem:[%s1648_s26 + $0x10] ss:$8 sps:$4 sm:$0xff]   ;;  %v1534_v18 = vld [vmem:[%s1648_s26 + $0x24] ss:$8 sps:$4 sm:$0xff]   ;;  %v1538_v20 = vld [vmem:[%s1648_s26 + $0x20] ss:$8 sps:$4 sm:$0xff]  }
  0x14   : > { %640 = vmatpush1.bf16.msra.mxu0 %v1516_v4  ;;  %1482 = vmatpush1.bf16.msra.mxu1 %v1516_v4  ;;  %v1533_v17 = vld [vmem:[%s1648_s26 + $0x90] ss:$8 sps:$4 sm:$0xff]   ;;  %v1536_v19 = vld [vmem:[%s1648_s26 + $0xa4] ss:$8 sps:$4 sm:$0xff]   ;;  %v1539_v21 = vld [vmem:[%s1648_s26 + $0xa0] ss:$8 sps:$4 sm:$0xff]  }
  0x15   : > { %641 = vmatprep.subr.bf16.mxu0 %v1594_v1  ;;  %1474 = vmatprep.subr.bf16.mxu1 %v1594_v1  ;;  %v1540_v22 = vld [vmem:[%s1648_s26 + $0x34] ss:$8 sps:$4 sm:$0xff]   ;;  %v1544_v24 = vld [vmem:[%s1648_s26 + $0x30] ss:$8 sps:$4 sm:$0xff]   ;;  %v1546_v26 = vld [vmem:[%s1648_s26 + $0x44] ss:$8 sps:$4 sm:$0xff]  }
  0x16   : > { %v1542_v23 = vld [vmem:[%s1648_s26 + $0xb4] ss:$8 sps:$4 sm:$0xff]   ;;  %v1545_v25 = vld [vmem:[%s1648_s26 + $0xb0] ss:$8 sps:$4 sm:$0xff]   ;;  %v1548_v27 = vld [vmem:[%s1648_s26 + $0xc4] ss:$8 sps:$4 sm:$0xff]  }
  0x17   : > { %v1550_v28 = vld [vmem:[%s1648_s26 + $0x40] ss:$8 sps:$4 sm:$0xff]   ;;  %v1552_v30 = vld [vmem:[%s1648_s26 + $0x54] ss:$8 sps:$4 sm:$0xff]   ;;  %v1556_v32 = vld [vmem:[%s1648_s26 + $0x50] ss:$8 sps:$4 sm:$0xff]  }
  0x18   : > { %642 = vmatpush1.bf16.msra.mxu0 %v1517_v7  ;;  %1483 = vmatpush1.bf16.msra.mxu1 %v1517_v7  ;;  %v1551_v29 = vld [vmem:[%s1648_s26 + $0xc0] ss:$8 sps:$4 sm:$0xff]   ;;  %v1554_v31 = vld [vmem:[%s1648_s26 + $0xd4] ss:$8 sps:$4 sm:$0xff]   ;;  %v1557_v33 = vld [vmem:[%s1648_s26 + $0xd0] ss:$8 sps:$4 sm:$0xff]  }
  0x19   : > { %643 = vmatprep.subr.bf16.mxu0 %v1594_v1  ;;  %1475 = vmatprep.subr.bf16.mxu1 %v1594_v1  ;;  %v1558_v34 = vld [vmem:[%s1648_s26 + $0x64] ss:$8 sps:$4 sm:$0xff]   ;;  %v1562_v36 = vld [vmem:[%s1648_s26 + $0x60] ss:$8 sps:$4 sm:$0xff]   ;;  %v1564_v38 = vld [vmem:[%s1648_s26 + $0x74] ss:$8 sps:$4 sm:$0xff]  }
  0x1a   : > { %v1560_v35 = vld [vmem:[%s1648_s26 + $0xe4] ss:$8 sps:$4 sm:$0xff]   ;;  %v1563_v37 = vld [vmem:[%s1648_s26 + $0xe0] ss:$8 sps:$4 sm:$0xff]   ;;  %v1566_v39 = vld [vmem:[%s1648_s26 + $0xf4] ss:$8 sps:$4 sm:$0xff]  }
  0x1b   : > { %v1568_v40 = vld [vmem:[%s1648_s26 + $0x70] ss:$8 sps:$4 sm:$0xff]  }
  0x1c   : > { %644 = vmatpush1.bf16.msra.mxu0 %v1518_v8  ;;  %1484 = vmatpush1.bf16.msra.mxu1 %v1518_v8  ;;  %v1569_v41 = vld [vmem:[%s1648_s26 + $0xf0] ss:$8 sps:$4 sm:$0xff]  }
  0x1d   : > { %645 = vmatprep.subr.bf16.mxu0 %v1594_v1  ;;  %1476 = vmatprep.subr.bf16.mxu1 %v1594_v1 }
  0x20   : > { %646 = vmatpush1.bf16.msra.mxu0 %v1519_v9  ;;  %1485 = vmatpush1.bf16.msra.mxu1 %v1519_v9 }
  0x21   : > { %647 = vmatprep.subr.bf16.mxu0 %v1594_v1  ;;  %1477 = vmatprep.subr.bf16.mxu1 %v1594_v1 }
  0x24   : > { %648 = vmatpush1.bf16.msra.mxu0 %v1520_v10  ;;  %1486 = vmatpush1.bf16.msra.mxu1 %v1520_v10 }
  0x25   : > { %649 = vmatprep.subr.bf16.mxu0 %v1594_v1  ;;  %1478 = vmatprep.subr.bf16.mxu1 %v1594_v1 }
  0x28   : > { %650 = vmatpush1.bf16.msra.mxu0 %v1521_v11  ;;  %1487 = vmatpush1.bf16.msra.mxu1 %v1521_v11 }
  0x2b   : > { %666 = vmatmul.mubr.bf16.vlgmr.msra.gmra.mrb[0].mxu0 %v1522_v12  ;;  %730 = vmatmul.mubr.bf16.vlgmr.msra.gmra.mrb[0].mxu1 %v1525_v13 }
  0x2c   : > { %1292 = vmatprep.mubr.msk.bf16.mxu0 %vm584_vm0, %v1528_v14  ;;  %1300 = vmatprep.mubr.msk.bf16.mxu1 %vm584_vm0, %v1530_v15 }
  0x33   : > { %674 = vmatmul.mubr.bf16.gmra.mrb[4].mxu0 %v1532_v16  ;;  %738 = vmatmul.mubr.bf16.gmra.mrb[4].mxu1 %v1533_v17 }
  0x34   : > { %1293 = vmatprep.mubr.msk.bf16.mxu0 %vm584_vm0, %v1534_v18  ;;  %1301 = vmatprep.mubr.msk.bf16.mxu1 %vm584_vm0, %v1536_v19 }
  0x3b   : > { %682 = vmatmul.mubr.bf16.gmra.mrb[8].mxu0 %v1538_v20  ;;  %746 = vmatmul.mubr.bf16.gmra.mrb[8].mxu1 %v1539_v21 }
  0x3c   : > { %1294 = vmatprep.mubr.msk.bf16.mxu0 %vm584_vm0, %v1540_v22  ;;  %1302 = vmatprep.mubr.msk.bf16.mxu1 %vm584_vm0, %v1542_v23 }
  0x43   : > { %690 = vmatmul.mubr.bf16.gmra.mrb[12].mxu0 %v1544_v24  ;;  %754 = vmatmul.mubr.bf16.gmra.mrb[12].mxu1 %v1545_v25 }
  0x44   : > { %1295 = vmatprep.mubr.msk.bf16.mxu0 %vm584_vm0, %v1546_v26  ;;  %1303 = vmatprep.mubr.msk.bf16.mxu1 %vm584_vm0, %v1548_v27 }
  0x4b   : > { %698 = vmatmul.mubr.bf16.gmra.mrb[16].mxu0 %v1550_v28  ;;  %762 = vmatmul.mubr.bf16.gmra.mrb[16].mxu1 %v1551_v29 }
  0x4c   : > { %1296 = vmatprep.mubr.msk.bf16.mxu0 %vm584_vm0, %v1552_v30  ;;  %1304 = vmatprep.mubr.msk.bf16.mxu1 %vm584_vm0, %v1554_v31 }
  0x53   : > { %706 = vmatmul.mubr.bf16.gmra.mrb[20].mxu0 %v1556_v32  ;;  %770 = vmatmul.mubr.bf16.gmra.mrb[20].mxu1 %v1557_v33 }
  0x54   : > { %1297 = vmatprep.mubr.msk.bf16.mxu0 %vm584_vm0, %v1558_v34  ;;  %1305 = vmatprep.mubr.msk.bf16.mxu1 %vm584_vm0, %v1560_v35 }
  0x5b   : > { %714 = vmatmul.mubr.bf16.gmra.mrb[24].mxu0 %v1562_v36  ;;  %778 = vmatmul.mubr.bf16.gmra.mrb[24].mxu1 %v1563_v37 }
  0x5c   : > { %1298 = vmatprep.mubr.msk.bf16.mxu0 %vm584_vm0, %v1564_v38  ;;  %1306 = vmatprep.mubr.msk.bf16.mxu1 %vm584_vm0, %v1566_v39 }
  0x63   : > { %722 = vmatmul.mubr.bf16.gmra.mrb[28].mxu0 %v1568_v40  ;;  %786 = vmatmul.mubr.bf16.gmra.mrb[28].mxu1 %v1569_v41 }
  0xfe   : > { %v667_v43 = vpop.f32.mrb[0].mxu0  ;;  %v731_v44 = vpop.f32.mrb[0].mxu1 }
  0xff   : > { %v900_v45 = vadd.f32 %v1719_v42, %v667_v43  ;;  %v916_v46 = vadd.f32 %v1719_v42, %v731_v44  ;;  %v669_v47 = vpop.f32.mrb[1].mxu0  ;;  %v733_v48 = vpop.f32.mrb[1].mxu1 }
 0x100   : > { %v670_v49 = vpop.f32.mrb[2].mxu0  ;;  %v734_v50 = vpop.f32.mrb[2].mxu1 }
 0x101   : > { %v901_v51 = vadd.f32 %v1719_v42, %v670_v49  ;;  %v917_v52 = vadd.f32 %v1719_v42, %v734_v50  ;;  %v672_v53 = vpop.f32.mrb[3].mxu0  ;;  %v736_v54 = vpop.f32.mrb[3].mxu1  ;;  %v932_v55 = vmax.f32 %v900_v45, 0.0  ;;  %v948_v56 = vmax.f32 %v916_v46, 0.0 }
 0x103   : > { %v933_v57 = vmax.f32 %v901_v51, 0.0  ;;  %v949_v58 = vmax.f32 %v917_v52, 0.0 }
 0x105   : > { %v1378_v59 = vpack.c.bf16 %v933_v57, %v932_v55  ;;  %v1418_v60 = vpack.c.bf16 %v949_v58, %v948_v56 }
 0x106   : > { %v675_v61 = vpop.f32.mrb[4].mxu0  ;;  %v739_v62 = vpop.f32.mrb[4].mxu1 }
 0x107   : > { %1379 = vst [vmem:[%s1729_s21] sm:$0xff] %v1378_v59   ;;  %1462 = vst [vmem:[%s1729_s21 + $0x40] sm:$0xff] %v1418_v60   ;;  %v902_v63 = vadd.f32 %v1719_v42, %v675_v61  ;;  %v918_v0 = vadd.f32 %v1719_v42, %v739_v62  ;;  %v677_v1 = vpop.f32.mrb[5].mxu0  ;;  %v741_v2 = vpop.f32.mrb[5].mxu1 }
 0x108   : > { %v678_v3 = vpop.f32.mrb[6].mxu0  ;;  %v742_v4 = vpop.f32.mrb[6].mxu1 }
 0x109   : > { %v903_v5 = vadd.f32 %v1719_v42, %v678_v3  ;;  %v919_v6 = vadd.f32 %v1719_v42, %v742_v4  ;;  %v680_v7 = vpop.f32.mrb[7].mxu0  ;;  %v744_v8 = vpop.f32.mrb[7].mxu1  ;;  %v934_v9 = vmax.f32 %v902_v63, 0.0  ;;  %v950_v10 = vmax.f32 %v918_v0, 0.0 }
 0x10b   : > { %v935_v11 = vmax.f32 %v903_v5, 0.0  ;;  %v951_v12 = vmax.f32 %v919_v6, 0.0 }
 0x10d   : > { %v1383_v13 = vpack.c.bf16 %v935_v11, %v934_v9  ;;  %v1423_v14 = vpack.c.bf16 %v951_v12, %v950_v10 }
 0x10e   : > { %v683_v15 = vpop.f32.mrb[8].mxu0  ;;  %v747_v16 = vpop.f32.mrb[8].mxu1 }
 0x10f   : > { %1455 = vst [vmem:[%s1729_s21 + $0x8] sm:$0xff] %v1383_v13   ;;  %1463 = vst [vmem:[%s1729_s21 + $0x48] sm:$0xff] %v1423_v14   ;;  %v904_v17 = vadd.f32 %v1719_v42, %v683_v15  ;;  %v920_v18 = vadd.f32 %v1719_v42, %v747_v16  ;;  %v685_v19 = vpop.f32.mrb[9].mxu0  ;;  %v749_v20 = vpop.f32.mrb[9].mxu1 }
 0x110   : > { %v686_v21 = vpop.f32.mrb[10].mxu0  ;;  %v750_v22 = vpop.f32.mrb[10].mxu1 }
 0x111   : > { %v905_v23 = vadd.f32 %v1719_v42, %v686_v21  ;;  %v921_v24 = vadd.f32 %v1719_v42, %v750_v22  ;;  %v688_v25 = vpop.f32.mrb[11].mxu0  ;;  %v752_v26 = vpop.f32.mrb[11].mxu1  ;;  %v936_v27 = vmax.f32 %v904_v17, 0.0  ;;  %v952_v28 = vmax.f32 %v920_v18, 0.0 }
 0x113   : > { %v937_v29 = vmax.f32 %v905_v23, 0.0  ;;  %v953_v30 = vmax.f32 %v921_v24, 0.0 }
 0x115   : > { %v1388_v31 = vpack.c.bf16 %v937_v29, %v936_v27  ;;  %v1428_v32 = vpack.c.bf16 %v953_v30, %v952_v28 }
 0x116   : > { %v691_v33 = vpop.f32.mrb[12].mxu0  ;;  %v755_v34 = vpop.f32.mrb[12].mxu1 }
 0x117   : > { %1456 = vst [vmem:[%s1729_s21 + $0x10] sm:$0xff] %v1388_v31   ;;  %1464 = vst [vmem:[%s1729_s21 + $0x50] sm:$0xff] %v1428_v32   ;;  %v906_v35 = vadd.f32 %v1719_v42, %v691_v33  ;;  %v922_v36 = vadd.f32 %v1719_v42, %v755_v34  ;;  %v693_v37 = vpop.f32.mrb[13].mxu0  ;;  %v757_v38 = vpop.f32.mrb[13].mxu1 }
 0x118   : > { %v694_v39 = vpop.f32.mrb[14].mxu0  ;;  %v758_v40 = vpop.f32.mrb[14].mxu1 }
 0x119   : > { %v907_v41 = vadd.f32 %v1719_v42, %v694_v39  ;;  %v923_v43 = vadd.f32 %v1719_v42, %v758_v40  ;;  %v696_v44 = vpop.f32.mrb[15].mxu0  ;;  %v760_v45 = vpop.f32.mrb[15].mxu1  ;;  %v938_v46 = vmax.f32 %v906_v35, 0.0  ;;  %v954_v47 = vmax.f32 %v922_v36, 0.0 }
 0x11b   : > { %v939_v48 = vmax.f32 %v907_v41, 0.0  ;;  %v955_v49 = vmax.f32 %v923_v43, 0.0 }
 0x11d   : > { %v1393_v50 = vpack.c.bf16 %v939_v48, %v938_v46  ;;  %v1433_v51 = vpack.c.bf16 %v955_v49, %v954_v47 }
 0x11e   : > { %v699_v52 = vpop.f32.mrb[16].mxu0  ;;  %v763_v53 = vpop.f32.mrb[16].mxu1 }
 0x11f   : > { %1457 = vst [vmem:[%s1729_s21 + $0x18] sm:$0xff] %v1393_v50   ;;  %1465 = vst [vmem:[%s1729_s21 + $0x58] sm:$0xff] %v1433_v51   ;;  %v908_v54 = vadd.f32 %v1719_v42, %v699_v52  ;;  %v924_v55 = vadd.f32 %v1719_v42, %v763_v53  ;;  %v701_v56 = vpop.f32.mrb[17].mxu0  ;;  %v765_v57 = vpop.f32.mrb[17].mxu1 }
 0x120   : > { %v702_v58 = vpop.f32.mrb[18].mxu0  ;;  %v766_v59 = vpop.f32.mrb[18].mxu1 }
 0x121   : > { %v909_v60 = vadd.f32 %v1719_v42, %v702_v58  ;;  %v925_v61 = vadd.f32 %v1719_v42, %v766_v59  ;;  %v704_v62 = vpop.f32.mrb[19].mxu0  ;;  %v768_v63 = vpop.f32.mrb[19].mxu1  ;;  %v940_v0 = vmax.f32 %v908_v54, 0.0  ;;  %v956_v1 = vmax.f32 %v924_v55, 0.0 }
 0x123   : > { %v941_v2 = vmax.f32 %v909_v60, 0.0  ;;  %v957_v3 = vmax.f32 %v925_v61, 0.0 }
 0x125   : > { %v1398_v4 = vpack.c.bf16 %v941_v2, %v940_v0  ;;  %v1438_v5 = vpack.c.bf16 %v957_v3, %v956_v1 }
 0x126   : > { %v707_v6 = vpop.f32.mrb[20].mxu0  ;;  %v771_v7 = vpop.f32.mrb[20].mxu1 }
 0x127   : > { %1458 = vst [vmem:[%s1729_s21 + $0x20] sm:$0xff] %v1398_v4   ;;  %1466 = vst [vmem:[%s1729_s21 + $0x60] sm:$0xff] %v1438_v5   ;;  %v910_v8 = vadd.f32 %v1719_v42, %v707_v6  ;;  %v926_v9 = vadd.f32 %v1719_v42, %v771_v7  ;;  %v709_v10 = vpop.f32.mrb[21].mxu0  ;;  %v773_v11 = vpop.f32.mrb[21].mxu1 }
 0x128   : > { %v710_v12 = vpop.f32.mrb[22].mxu0  ;;  %v774_v13 = vpop.f32.mrb[22].mxu1 }
 0x129   : > { %v911_v14 = vadd.f32 %v1719_v42, %v710_v12  ;;  %v927_v15 = vadd.f32 %v1719_v42, %v774_v13  ;;  %v712_v16 = vpop.f32.mrb[23].mxu0  ;;  %v776_v17 = vpop.f32.mrb[23].mxu1  ;;  %v942_v18 = vmax.f32 %v910_v8, 0.0  ;;  %v958_v19 = vmax.f32 %v926_v9, 0.0 }
 0x12b   : > { %v943_v20 = vmax.f32 %v911_v14, 0.0  ;;  %v959_v21 = vmax.f32 %v927_v15, 0.0 }
 0x12d   : > { %v1403_v22 = vpack.c.bf16 %v943_v20, %v942_v18  ;;  %v1443_v23 = vpack.c.bf16 %v959_v21, %v958_v19 }
 0x12e   : > { %v715_v24 = vpop.f32.mrb[24].mxu0  ;;  %v779_v25 = vpop.f32.mrb[24].mxu1 }
 0x12f   : > { %1459 = vst [vmem:[%s1729_s21 + $0x28] sm:$0xff] %v1403_v22   ;;  %1467 = vst [vmem:[%s1729_s21 + $0x68] sm:$0xff] %v1443_v23   ;;  %v912_v26 = vadd.f32 %v1719_v42, %v715_v24  ;;  %v928_v27 = vadd.f32 %v1719_v42, %v779_v25  ;;  %v717_v28 = vpop.f32.mrb[25].mxu0  ;;  %v781_v29 = vpop.f32.mrb[25].mxu1 }
 0x130   : > { %v718_v30 = vpop.f32.mrb[26].mxu0  ;;  %v782_v31 = vpop.f32.mrb[26].mxu1 }
 0x131   : > { %v913_v32 = vadd.f32 %v1719_v42, %v718_v30  ;;  %v929_v33 = vadd.f32 %v1719_v42, %v782_v31  ;;  %v720_v34 = vpop.f32.mrb[27].mxu0  ;;  %v784_v35 = vpop.f32.mrb[27].mxu1  ;;  %v944_v36 = vmax.f32 %v912_v26, 0.0  ;;  %v960_v37 = vmax.f32 %v928_v27, 0.0 }
 0x133   : > { %v945_v38 = vmax.f32 %v913_v32, 0.0  ;;  %v961_v39 = vmax.f32 %v929_v33, 0.0 }
 0x135   : > { %v1408_v40 = vpack.c.bf16 %v945_v38, %v944_v36  ;;  %v1448_v41 = vpack.c.bf16 %v961_v39, %v960_v37 }
 0x136   : > { %v723_v43 = vpop.f32.mrb[28].mxu0  ;;  %v787_v44 = vpop.f32.mrb[28].mxu1 }
 0x137   : > { %1460 = vst [vmem:[%s1729_s21 + $0x30] sm:$0xff] %v1408_v40   ;;  %1468 = vst [vmem:[%s1729_s21 + $0x70] sm:$0xff] %v1448_v41   ;;  %v914_v45 = vadd.f32 %v1719_v42, %v723_v43  ;;  %v930_v46 = vadd.f32 %v1719_v42, %v787_v44  ;;  %v725_v47 = vpop.f32.mrb[29].mxu0  ;;  %v789_v48 = vpop.f32.mrb[29].mxu1 }
 0x138   : > { %v726_v49 = vpop.f32.mrb[30].mxu0  ;;  %v790_v50 = vpop.f32.mrb[30].mxu1 }
 0x139   : > { %v915_v51 = vadd.f32 %v1719_v42, %v726_v49  ;;  %v931_v52 = vadd.f32 %v1719_v42, %v790_v50  ;;  %v728_v53 = vpop.f32.mrb[31].mxu0  ;;  %v792_v54 = vpop.f32.mrb[31].mxu1  ;;  %v946_v55 = vmax.f32 %v914_v45, 0.0  ;;  %v962_v56 = vmax.f32 %v930_v46, 0.0 }
 0x13b   : > { %v947_v57 = vmax.f32 %v915_v51, 0.0  ;;  %v963_v58 = vmax.f32 %v931_v52, 0.0 }
 0x13d   : > { %v1413_v59 = vpack.c.bf16 %v947_v57, %v946_v55  ;;  %v1453_v60 = vpack.c.bf16 %v963_v58, %v962_v56 }
 0x13f   : > { %1461 = vst [vmem:[%s1729_s21 + $0x38] sm:$0xff] %v1413_v59   ;;  %1469 = vst [vmem:[%s1729_s21 + $0x78] sm:$0xff] %v1453_v60  }
 0x140 PF: > { %s13_s14 = sadd.s32 1, %s1592_s14   ;;  %s1788_s12 = smov %s1588_s13 }
 0x141   : > { %p10_p5 = scmp.ge.s32.totalorder %s13_s14, 4   ;;  %s1789_s13 = smov %s1791_s15 }
 0x143   :  { %12 = sbr.rel (!%p10_p5) target bundleno = 2 (0x2), region = 76 }

// kernel: _lambda_.6
= control target key start
LH: loop header
LB: loop body
LE: loop exit
PB: predicated region body
PF: predicated region fallthrough
CT: control target
= control target key end

     0   :  { %s1426_s12 = smov 0   ;;  %s1428_s13 = smov 0   ;;  %s1561_s0 = inlined_call_operand.vmem [shape: bf16[512,32], index: 0, kind: input, shape index: {}]   ;;  %s1562_s1 = inlined_call_operand.vmem [shape: bf16[32,128], index: 1, kind: input, shape index: {}]   ;;  %s1563_s2 = inlined_call_operand.vmem [shape: f32[1,128], index: 2, kind: input, shape index: {}]   ;;  %s1564_s3 = inlined_call_operand.vmem [shape: bf16[512,128], index: 3, kind: output, shape index: {}]  }
   0x1   :  { %s1430_s14 = smov 0  }
   0x2 LB: > { %s32_s15 = sadd.s32 1, %s1400_s13  ;;  %p1081_p0 = scmp.ge.s32.totalorder %s1404_s14, 1  ;;  %s1404_s14 = sphi %s1430_s14, %s13_s14   ;;  %s1400_s13 = sphi %s1428_s13, %s1566_s13   ;;  %s1396_s12 = sphi %s1426_s12, %s1565_s12  }
   0x3   : > { %p34_p1 = scmp.ge.s32.totalorder %s32_s15, 2  ;;  %p188_p2 = scmp.lt.s32.totalorder %s1404_s14, 3 }
   0x5   : > { %s1568_s15 = smov (%p34_p1, %s32_s15), 0  ;;  %p189_p3 = pnand %p1081_p0, %p188_p2 }
   0x6   : > { %v1364_v0 = vld [vmem:[%s1562_s1] sm:$0xff] (!%p189_p3)   ;;  %s1082_s18 = sshll.u32 (!%p189_p3), %s1396_s12, 5  ;;  %v1365_v1 = vld [vmem:[%s1562_s1 + $0x8] sm:$0xff] (!%p189_p3)   ;;  %vm456_vm0 = vcmask (!%p189_p3), 261120  }
   0x7   : > { %192 = sbr.rel (%p189_p3) target bundleno = 264 (0x108), region = 32  ;;  %p230_p4 = scmp.lt.s32.totalorder (!%p189_p3), %s1082_s18, 63  ;;  %1300 = vmatprep.subr.bf16.mxu0 (!%p189_p3), %v1364_v0  ;;  %1336 = vmatprep.subr.bf16.mxu1 (!%p189_p3), %v1364_v0  ;;  %v1495_v19 = vld [vmem:[%s1563_s2] ss:$0 sm:$0xff] (!%p189_p3) }
   0x8   : > { %1301 = vmatpush3.bf16.msra.mxu0 (!%p189_p3), %v1364_v0  ;;  %1338 = vmatpush3.bf16.msra.mxu1 (!%p189_p3), %v1364_v0 }
   0x9   : > { %1302 = vmatprep.subr.bf16.mxu0 (!%p189_p3), %v1365_v1  ;;  %1337 = vmatprep.subr.bf16.mxu1 (!%p189_p3), %v1365_v1 }
   0xc   : > { %1303 = vmatpush3.bf16.msra.mxu0 (!%p189_p3), %v1365_v1  ;;  %1339 = vmatpush3.bf16.msra.mxu1 (!%p189_p3), %v1365_v1 }
   0xe   : > { %s1570_s18 = smov (!%p230_p4, %s1082_s18), 63 }
   0xf   : > { %s1083_s21 = sshll.u32 %s1570_s18, 2 }
  0x10   : > { %s1458_s24 = scalar_lea.vmem %s1561_s0, %s1083_s21  ;;  %s1506_s29 = scalar_lea.vmem %s1564_s3, %s1083_s21 }
  0x11   : > { %v1366_v2 = vld [vmem:[%s1458_s24] sm:$0xff]   ;;  %v1368_v4 = vld [vmem:[%s1458_s24 + $0x8] sm:$0xff]   ;;  %v1370_v6 = vld [vmem:[%s1458_s24 + $0x10] sm:$0xff]  }
  0x12   : > { %v1367_v3 = vld [vmem:[%s1458_s24 + $0x40] sm:$0xff]   ;;  %1304 = vmatprep.mubr.msk.bf16.mxu0 %vm456_vm0, %v1366_v2  ;;  %v1369_v5 = vld [vmem:[%s1458_s24 + $0x48] sm:$0xff]   ;;  %v1371_v7 = vld [vmem:[%s1458_s24 + $0x50] sm:$0xff]  }
  0x13   : > { %1320 = vmatprep.mubr.msk.bf16.mxu1 %vm456_vm0, %v1367_v3  ;;  %1305 = vmatmul.mubr.msk.bf16.vlgmr.msra.gmra.mrb[0].mxu0 %vm456_vm0, %v1368_v4  ;;  %v1372_v8 = vld [vmem:[%s1458_s24 + $0x18] sm:$0xff]   ;;  %v1374_v10 = vld [vmem:[%s1458_s24 + $0x20] sm:$0xff]   ;;  %v1376_v12 = vld [vmem:[%s1458_s24 + $0x28] sm:$0xff]  }
  0x14   : > { %1321 = vmatmul.mubr.msk.bf16.vlgmr.msra.gmra.mrb[0].mxu1 %vm456_vm0, %v1369_v5  ;;  %1308 = vmatprep.mubr.msk.bf16.mxu0 %vm456_vm0, %v1370_v6  ;;  %v1373_v9 = vld [vmem:[%s1458_s24 + $0x58] sm:$0xff]   ;;  %v1375_v11 = vld [vmem:[%s1458_s24 + $0x60] sm:$0xff]   ;;  %v1377_v13 = vld [vmem:[%s1458_s24 + $0x68] sm:$0xff]  }
  0x15   : > { %1324 = vmatprep.mubr.msk.bf16.mxu1 %vm456_vm0, %v1371_v7  ;;  %v1378_v14 = vld [vmem:[%s1458_s24 + $0x30] sm:$0xff]   ;;  %v1380_v16 = vld [vmem:[%s1458_s24 + $0x38] sm:$0xff]  }
  0x16   : > { %v1379_v15 = vld [vmem:[%s1458_s24 + $0x70] sm:$0xff]   ;;  %v1381_v17 = vld [vmem:[%s1458_s24 + $0x78] sm:$0xff]  }
  0x1b   : > { %1309 = vmatmul.mubr.msk.bf16.gmra.mrb[4].mxu0 %vm456_vm0, %v1372_v8 }
  0x1c   : > { %1325 = vmatmul.mubr.msk.bf16.gmra.mrb[4].mxu1 %vm456_vm0, %v1373_v9  ;;  %1312 = vmatprep.mubr.msk.bf16.mxu0 %vm456_vm0, %v1374_v10 }
  0x1d   : > { %1328 = vmatprep.mubr.msk.bf16.mxu1 %vm456_vm0, %v1375_v11 }
  0x23   : > { %1313 = vmatmul.mubr.msk.bf16.gmra.mrb[8].mxu0 %vm456_vm0, %v1376_v12 }
  0x24   : > { %1329 = vmatmul.mubr.msk.bf16.gmra.mrb[8].mxu1 %vm456_vm0, %v1377_v13  ;;  %1316 = vmatprep.mubr.msk.bf16.mxu0 %vm456_vm0, %v1378_v14 }
  0x25   : > { %1332 = vmatprep.mubr.msk.bf16.mxu1 %vm456_vm0, %v1379_v15 }
  0x2b   : > { %1317 = vmatmul.mubr.msk.bf16.gmra.mrb[12].mxu0 %vm456_vm0, %v1380_v16 }
  0x2c   : > { %1333 = vmatmul.mubr.msk.bf16.gmra.mrb[12].mxu1 %vm456_vm0, %v1381_v17 }
  0xe6   : > { %v1306_v18 = vpop.f32.mrb[0].mxu0 }
  0xe7   : > { %v1322_v20 = vpop.f32.mrb[0].mxu1  ;;  %v539_v21 = vpop.f32.mrb[1].mxu0  ;;  %v774_v24 = vadd.f32 %v1306_v18, %v1495_v19 }
  0xe8   : > { %v603_v22 = vpop.f32.mrb[1].mxu1  ;;  %v1307_v23 = vpop.f32.mrb[2].mxu0  ;;  %v790_v28 = vadd.f32 %v1322_v20, %v1495_v19  ;;  %v772_v29 = vadd.f32 %v1495_v19, %v539_v21 }
  0xe9   : > { %v775_v25 = vadd.f32 %v1307_v23, %v1495_v19  ;;  %v1323_v26 = vpop.f32.mrb[2].mxu1  ;;  %v542_v27 = vpop.f32.mrb[3].mxu0  ;;  %v788_v33 = vadd.f32 %v1495_v19, %v603_v22 }
  0xea   : > { %v791_v30 = vadd.f32 %v1323_v26, %v1495_v19  ;;  %v773_v31 = vadd.f32 %v1495_v19, %v542_v27  ;;  %v606_v32 = vpop.f32.mrb[3].mxu1 }
  0xeb   : > { %v1195_v34 = vpack.c.bf16 %v775_v25, %v774_v24  ;;  %v789_v35 = vadd.f32 %v1495_v19, %v606_v32 }
  0xec   : > { %v1235_v36 = vpack.c.bf16 %v791_v30, %v790_v28  ;;  %v1190_v37 = vpack.c.bf16 %v773_v31, %v772_v29 }
  0xed   : > { %1267 = vst [vmem:[%s1506_s29 + $0x8] sm:$0xff] %v1195_v34   ;;  %v1230_v38 = vpack.c.bf16 %v789_v35, %v788_v33 }
  0xee   : > { %1275 = vst [vmem:[%s1506_s29 + $0x48] sm:$0xff] %v1235_v36   ;;  %1191 = vst [vmem:[%s1506_s29] sm:$0xff] %v1190_v37   ;;  %v1310_v39 = vpop.f32.mrb[4].mxu0 }
  0xef   : > { %1274 = vst [vmem:[%s1506_s29 + $0x40] sm:$0xff] %v1230_v38   ;;  %v1326_v40 = vpop.f32.mrb[4].mxu1  ;;  %v555_v41 = vpop.f32.mrb[5].mxu0  ;;  %v778_v44 = vadd.f32 %v1310_v39, %v1495_v19 }
  0xf0   : > { %v619_v42 = vpop.f32.mrb[5].mxu1  ;;  %v1311_v43 = vpop.f32.mrb[6].mxu0  ;;  %v794_v48 = vadd.f32 %v1326_v40, %v1495_v19  ;;  %v776_v49 = vadd.f32 %v1495_v19, %v555_v41 }
  0xf1   : > { %v779_v45 = vadd.f32 %v1311_v43, %v1495_v19  ;;  %v1327_v46 = vpop.f32.mrb[6].mxu1  ;;  %v558_v47 = vpop.f32.mrb[7].mxu0  ;;  %v792_v53 = vadd.f32 %v1495_v19, %v619_v42 }
  0xf2   : > { %v795_v50 = vadd.f32 %v1327_v46, %v1495_v19  ;;  %v777_v51 = vadd.f32 %v1495_v19, %v558_v47  ;;  %v622_v52 = vpop.f32.mrb[7].mxu1 }
  0xf3   : > { %v1205_v54 = vpack.c.bf16 %v779_v45, %v778_v44  ;;  %v793_v55 = vadd.f32 %v1495_v19, %v622_v52 }
  0xf4   : > { %v1245_v56 = vpack.c.bf16 %v795_v50, %v794_v48  ;;  %v1200_v57 = vpack.c.bf16 %v777_v51, %v776_v49 }
  0xf5   : > { %1269 = vst [vmem:[%s1506_s29 + $0x18] sm:$0xff] %v1205_v54   ;;  %v1240_v58 = vpack.c.bf16 %v793_v55, %v792_v53 }
  0xf6   : > { %1277 = vst [vmem:[%s1506_s29 + $0x58] sm:$0xff] %v1245_v56   ;;  %1268 = vst [vmem:[%s1506_s29 + $0x10] sm:$0xff] %v1200_v57   ;;  %v1314_v59 = vpop.f32.mrb[8].mxu0 }
  0xf7   : > { %1276 = vst [vmem:[%s1506_s29 + $0x50] sm:$0xff] %v1240_v58   ;;  %v1330_v60 = vpop.f32.mrb[8].mxu1  ;;  %v571_v61 = vpop.f32.mrb[9].mxu0  ;;  %v782_v0 = vadd.f32 %v1314_v59, %v1495_v19 }
  0xf8   : > { %v635_v62 = vpop.f32.mrb[9].mxu1  ;;  %v1315_v63 = vpop.f32.mrb[10].mxu0  ;;  %v798_v4 = vadd.f32 %v1330_v60, %v1495_v19  ;;  %v780_v5 = vadd.f32 %v1495_v19, %v571_v61 }
  0xf9   : > { %v783_v1 = vadd.f32 %v1315_v63, %v1495_v19  ;;  %v1331_v2 = vpop.f32.mrb[10].mxu1  ;;  %v574_v3 = vpop.f32.mrb[11].mxu0  ;;  %v796_v9 = vadd.f32 %v1495_v19, %v635_v62 }
  0xfa   : > { %v799_v6 = vadd.f32 %v1331_v2, %v1495_v19  ;;  %v781_v7 = vadd.f32 %v1495_v19, %v574_v3  ;;  %v638_v8 = vpop.f32.mrb[11].mxu1 }
  0xfb   : > { %v1215_v10 = vpack.c.bf16 %v783_v1, %v782_v0  ;;  %v797_v11 = vadd.f32 %v1495_v19, %v638_v8 }
  0xfc   : > { %v1255_v12 = vpack.c.bf16 %v799_v6, %v798_v4  ;;  %v1210_v13 = vpack.c.bf16 %v781_v7, %v780_v5 }
  0xfd   : > { %1271 = vst [vmem:[%s1506_s29 + $0x28] sm:$0xff] %v1215_v10   ;;  %v1250_v14 = vpack.c.bf16 %v797_v11, %v796_v9 }
  0xfe   : > { %1279 = vst [vmem:[%s1506_s29 + $0x68] sm:$0xff] %v1255_v12   ;;  %1270 = vst [vmem:[%s1506_s29 + $0x20] sm:$0xff] %v1210_v13   ;;  %v1318_v15 = vpop.f32.mrb[12].mxu0 }
  0xff   : > { %1278 = vst [vmem:[%s1506_s29 + $0x60] sm:$0xff] %v1250_v14   ;;  %v1334_v16 = vpop.f32.mrb[12].mxu1  ;;  %v587_v17 = vpop.f32.mrb[13].mxu0  ;;  %v786_v21 = vadd.f32 %v1318_v15, %v1495_v19 }
 0x100   : > { %v651_v18 = vpop.f32.mrb[13].mxu1  ;;  %v1319_v20 = vpop.f32.mrb[14].mxu0  ;;  %v802_v25 = vadd.f32 %v1334_v16, %v1495_v19  ;;  %v784_v26 = vadd.f32 %v1495_v19, %v587_v17 }
 0x101   : > { %v787_v22 = vadd.f32 %v1319_v20, %v1495_v19  ;;  %v1335_v23 = vpop.f32.mrb[14].mxu1  ;;  %v590_v24 = vpop.f32.mrb[15].mxu0  ;;  %v800_v30 = vadd.f32 %v1495_v19, %v651_v18 }
 0x102   : > { %v803_v27 = vadd.f32 %v1335_v23, %v1495_v19  ;;  %v785_v28 = vadd.f32 %v1495_v19, %v590_v24  ;;  %v654_v29 = vpop.f32.mrb[15].mxu1 }
 0x103   : > { %v1225_v31 = vpack.c.bf16 %v787_v22, %v786_v21  ;;  %v801_v32 = vadd.f32 %v1495_v19, %v654_v29 }
 0x104   : > { %v1265_v33 = vpack.c.bf16 %v803_v27, %v802_v25  ;;  %v1220_v34 = vpack.c.bf16 %v785_v28, %v784_v26 }
 0x105   : > { %1273 = vst [vmem:[%s1506_s29 + $0x38] sm:$0xff] %v1225_v31   ;;  %v1260_v35 = vpack.c.bf16 %v801_v32, %v800_v30 }
 0x106   : > { %1281 = vst [vmem:[%s1506_s29 + $0x78] sm:$0xff] %v1265_v33   ;;  %1272 = vst [vmem:[%s1506_s29 + $0x30] sm:$0xff] %v1220_v34  }
 0x107   : > { %1280 = vst [vmem:[%s1506_s29 + $0x70] sm:$0xff] %v1260_v35  }
 0x108 PF: > { %s13_s14 = sadd.s32 1, %s1404_s14   ;;  %s1565_s12 = smov %s1400_s13 }
 0x109   : > { %p10_p5 = scmp.ge.s32.totalorder %s13_s14, 4   ;;  %s1566_s13 = smov %s1568_s15 }
 0x10b   :  { %12 = sbr.rel (!%p10_p5) target bundleno = 2 (0x2), region = 76 }

// kernel: _lambda_.7
= control target key start
LH: loop header
LB: loop body
LE: loop exit
PB: predicated region body
PF: predicated region fallthrough
CT: control target
= control target key end

     0   :  { %9 = vsyncpa [#allocation4], 0  ;;  %s1770_s0 = inlined_call_operand.vmem [shape: bf16[512,16], index: 0, kind: input, shape index: {}]   ;;  %s1771_s1 = inlined_call_operand.vmem [shape: bf16[16,128], index: 1, kind: input, shape index: {}]   ;;  %s1772_s2 = inlined_call_operand.vmem [shape: f32[1,128], index: 2, kind: input, shape index: {}]   ;;  %s1773_s3 = inlined_call_operand.vmem [shape: bf16[512,128], index: 3, kind: input, shape index: {}]   ;;  %s1774_s4 = inlined_call_operand.hbm [shape: f32[512,128], index: 4, kind: output, shape index: {}]  }
   0x1   :  { %11 = vsyncpa [#allocation4 + $0x1], 0  ;;  %s1512_s15 = smov 0   ;;  %s1514_s16 = smov 0  }
   0x2   :  { %s1516_s17 = smov 0   ;;  %s1518_s18 = smov 0  }
   0x3   :  { %s1520_s19 = smov 0   ;;  %s1522_s20 = smov 0  }
   0x4 LB: > { %s1146_s21 = sadd.s32 4294967295, %s1482_s20   ;;  %s1147_s22 = sadd.s32 4294967294, %s1482_s20   ;;  %s1482_s20 = sphi %s1522_s20, %s17_s20   ;;  %s1478_s19 = sphi %s1520_s19, %s1781_s19   ;;  %s1474_s18 = sphi %s1518_s18, %s1780_s18   ;;  %s1470_s17 = sphi %s1516_s17, %s1779_s17   ;;  %s1466_s16 = sphi %s1514_s16, %s1778_s16   ;;  %s1462_s15 = sphi %s1512_s15, %s1777_s15  }
   0x5   : > { %s36_s23 = sadd.s32 1, %s1478_s19  ;;  %s155_s24 = sadd.s32 1, %s1470_s17 }
   0x6   : > { %p38_p0 = scmp.ge.s32.totalorder %s36_s23, 2  ;;  %p165_p1 = scmp.ne.s32.totalorder %s1470_s17, %s1466_s16 }
   0x7   : > { %p166_p2 = scmp.eq.s32.totalorder %s1146_s21, 1  ;;  %p171_p3 = scmp.ne.s32.totalorder %s1466_s16, %s1462_s15 }
   0x8   : > { %s1783_s23 = smov (%p38_p0, %s36_s23), 0  ;;  %p172_p5 = scmp.eq.s32.totalorder %s1147_s22, 1 }
   0x9   : > { %p1552_p4 = por %p166_p2, %p165_p1  ;;  %s150_s26 = ssub.s32 %s1478_s19, %s1783_s23 }
   0xa   : > { %p1152_p6 = scmp.ge.s32.totalorder %s1482_s20, 1  ;;  %p153_p7 = scmp.eq.s32.totalorder %s150_s26, 0 }
   0xb   : > { %p1559_p8 = por %p172_p5, %p171_p3  ;;  %p232_p9 = scmp.lt.s32.totalorder %s1482_s20, 3 }
   0xc   : > { %s1565_s28 = scalar_select %p153_p7, %s1470_s17, %s155_s24  }
   0xd   : > { %p233_p10 = pnand %p1152_p6, %p232_p9 }
   0xe   : > { %v1387_v0 = vld [vmem:[%s1771_s1] sm:$0xff] (!%p233_p10)   ;;  %s1154_s5 = sshll.u32 (!%p233_p10), %s1474_s18, 5  ;;  %vm500_vm0 = vcmask (!%p233_p10), 130048   ;;  %s277_s13 = sand.u32 (!%p233_p10), 1, %s1466_s16  }
   0xf   : > { %236 = sbr.rel (%p233_p10) target bundleno = 288 (0x120), region = 36  ;;  %p281_p11 = scmp.lt.s32.totalorder (!%p233_p10), %s1154_s5, 63  ;;  %1294 = vmatprep.subr.bf16.mxu0 (!%p233_p10), %v1387_v0  ;;  %1328 = vmatprep.subr.bf16.mxu1 (!%p233_p10), %v1387_v0  ;;  %v1627_v20 = vld [vmem:[%s1772_s2] ss:$0 sm:$0xff] (!%p233_p10) }
  0x10   : > { %1295 = vmatpush3.bf16.msra.mxu0 (!%p233_p10), %v1387_v0  ;;  %1329 = vmatpush3.bf16.msra.mxu1 (!%p233_p10), %v1387_v0  ;;  %s1632_s22 = sshll.u32 (!%p233_p10), %s277_s13, 8  ;;  %s1197_s26 = sshll.u32 (!%p233_p10), %s1474_s18, 12 }
  0x11   : > { %s1647_s24 = scalar_lea.vmem (!%p233_p10), [#allocation3], %s1632_s22  ;;  %s1484_s8 = smov (!%p233_p10), [#allocation3]  }
  0x12   : > { %s1023_s29 = sshll.u32 (!%p233_p10), %s1647_s24, 4  ;;  %s1715_s29 = int_to_ptr.vmem [resolvable:$true] %s1023_s29 }
  0x13   : > { %s1404_s7 = scalar_lea.vmem (!%p233_p10), %s1715_s29, 4096 }
  0x14   : > { %p1405_p12 = scmp.ne.s32.totalorder (!%p233_p10), %s1715_s29, %s1404_s7 }
  0x16   : > { %s1785_s5 = smov (!%p281_p11, %s1154_s5), 63  ;;  %p1406_p13 = pnand %p1405_p12, %p1552_p4 }
  0x17   : > { %s1155_s6 = sshll.u32 %s1785_s5, 2  ;;  %s1713_s5 = scalar_lea.hbm %s1774_s4, %s1197_s26 }
  0x18   : > { %s1579_s9 = scalar_lea.vmem %s1770_s0, %s1155_s6  ;;  %s1618_s12 = scalar_lea.vmem %s1773_s3, %s1155_s6 }
  0x19   : > { %v1388_v1 = vld [vmem:[%s1579_s9] sm:$0xff]   ;;  %v1390_v3 = vld [vmem:[%s1579_s9 + $0x8] sm:$0xff]   ;;  %v1392_v5 = vld [vmem:[%s1579_s9 + $0x10] sm:$0xff]   ;;  %s1724_s6 = scalar_lea.sflag [#allocation4], %s277_s13  ;;  %p1407_p0 = pneg %p1406_p13 }
  0x1a   : > { %v1389_v2 = vld [vmem:[%s1579_s9 + $0x40] sm:$0xff]   ;;  %1296 = vmatprep.mubr.msk.bf16.mxu0 %vm500_vm0, %v1388_v1  ;;  %v1391_v4 = vld [vmem:[%s1579_s9 + $0x48] sm:$0xff]   ;;  %v1393_v6 = vld [vmem:[%s1579_s9 + $0x50] sm:$0xff]  }
  0x1b   : > { %1312 = vmatprep.mubr.msk.bf16.mxu1 %vm500_vm0, %v1389_v2  ;;  %1297 = vmatmul.mubr.msk.bf16.vlgmr.msra.gmra.mrb[0].mxu0 %vm500_vm0, %v1390_v3  ;;  %v1394_v7 = vld [vmem:[%s1579_s9 + $0x18] sm:$0xff]   ;;  %v1396_v9 = vld [vmem:[%s1579_s9 + $0x20] sm:$0xff]   ;;  %v1398_v11 = vld [vmem:[%s1579_s9 + $0x28] sm:$0xff]  }
  0x1c   : > { %1313 = vmatmul.mubr.msk.bf16.vlgmr.msra.gmra.mrb[0].mxu1 %vm500_vm0, %v1391_v4  ;;  %1300 = vmatprep.mubr.msk.bf16.mxu0 %vm500_vm0, %v1392_v5  ;;  %v1395_v8 = vld [vmem:[%s1579_s9 + $0x58] sm:$0xff]   ;;  %v1397_v10 = vld [vmem:[%s1579_s9 + $0x60] sm:$0xff]   ;;  %v1399_v12 = vld [vmem:[%s1579_s9 + $0x68] sm:$0xff]  }
  0x1d   : > { %1316 = vmatprep.mubr.msk.bf16.mxu1 %vm500_vm0, %v1393_v6  ;;  %v1400_v13 = vld [vmem:[%s1579_s9 + $0x30] sm:$0xff]   ;;  %v1402_v15 = vld [vmem:[%s1579_s9 + $0x38] sm:$0xff]   ;;  %v1262_v17 = vld [vmem:[%s1618_s12 + $0x8] sm:$0xff]  }
  0x1e   : > { %v1401_v14 = vld [vmem:[%s1579_s9 + $0x70] sm:$0xff]   ;;  %v1403_v16 = vld [vmem:[%s1579_s9 + $0x78] sm:$0xff]   ;;  %v1270_v18 = vld [vmem:[%s1618_s12 + $0x48] sm:$0xff]   ;;  %v1204_v22 = vunpack.c.l.bf16 %v1262_v17  ;;  %v1205_v30 = vunpack.c.h.bf16 %v1262_v17  ;;  %s1408_s9 = sshll.u32 %s1484_s8, 4  ;;  %s1409_s9 = int_to_ptr.vmem [resolvable:$false] %s1408_s9 }
  0x1f   : > { %v1199_v19 = vld [vmem:[%s1618_s12] sm:$0xff]   ;;  %v1236_v24 = vunpack.c.l.bf16 %v1270_v18  ;;  %v1237_v35 = vunpack.c.h.bf16 %v1270_v18  ;;  %v1264_v48 = vld [vmem:[%s1618_s12 + $0x18] sm:$0xff]   ;;  %v1263_v54 = vld [vmem:[%s1618_s12 + $0x10] sm:$0xff]   ;;  %s1410_s10 = scalar_lea.vmem %s1409_s9, 8192  ;;  %p1411_p1 = scmp.lt.s32.totalorder %s1715_s29, %s1409_s9 }
  0x20   : > { %v1269_v21 = vld [vmem:[%s1618_s12 + $0x40] sm:$0xff]   ;;  %v1200_v25 = vunpack.c.l.bf16 %v1199_v19  ;;  %v1201_v36 = vunpack.c.h.bf16 %v1199_v19  ;;  %v1272_v53 = vld [vmem:[%s1618_s12 + $0x58] sm:$0xff]   ;;  %v1271_v59 = vld [vmem:[%s1618_s12 + $0x50] sm:$0xff]   ;;  %v1212_v63 = vunpack.c.l.bf16 %v1264_v48  ;;  %v1208_v4 = vunpack.c.l.bf16 %v1263_v54  ;;  %p1412_p2 = scmp.lt.s32.totalorder %s1410_s10, %s1404_s7 }
  0x21   : > { %v1232_v29 = vunpack.c.l.bf16 %v1269_v21  ;;  %v1233_v42 = vunpack.c.h.bf16 %v1269_v21  ;;  %v1244_v3 = vunpack.c.l.bf16 %v1272_v53 }
  0x22   : > { %p1413_p3 = por %p1412_p2, %p1411_p1 }
  0x23   : > { %1301 = vmatmul.mubr.msk.bf16.gmra.mrb[4].mxu0 %vm500_vm0, %v1394_v7 }
  0x24   : > { %1317 = vmatmul.mubr.msk.bf16.gmra.mrb[4].mxu1 %vm500_vm0, %v1395_v8  ;;  %1304 = vmatprep.mubr.msk.bf16.mxu0 %vm500_vm0, %v1396_v9  ;;  %v1240_v9 = vunpack.c.l.bf16 %v1271_v59  ;;  %p1414_p5 = pnand %p1413_p3, %p1407_p0 }
  0x25   : > { %1320 = vmatprep.mubr.msk.bf16.mxu1 %vm500_vm0, %v1397_v10  ;;  %v1213_v10 = vunpack.c.h.bf16 %v1264_v48 }
  0x2b   : > { %1305 = vmatmul.mubr.msk.bf16.gmra.mrb[8].mxu0 %vm500_vm0, %v1398_v11 }
  0x2c   : > { %1321 = vmatmul.mubr.msk.bf16.gmra.mrb[8].mxu1 %vm500_vm0, %v1399_v12  ;;  %1308 = vmatprep.mubr.msk.bf16.mxu0 %vm500_vm0, %v1400_v13 }
  0x2d   : > { %1324 = vmatprep.mubr.msk.bf16.mxu1 %vm500_vm0, %v1401_v14 }
  0x33   : > { %1309 = vmatmul.mubr.msk.bf16.gmra.mrb[12].mxu0 %vm500_vm0, %v1402_v15  ;;  %v1245_v15 = vunpack.c.h.bf16 %v1272_v53 }
  0x34   : > { %1325 = vmatmul.mubr.msk.bf16.gmra.mrb[12].mxu1 %vm500_vm0, %v1403_v16  ;;  %v1209_v16 = vunpack.c.h.bf16 %v1263_v54 }
  0xee   : > { %v1298_v23 = vpop.f32.mrb[0].mxu0 }
  0xef   : > { %v818_v26 = vadd.f32 %v1298_v23, %v1627_v20  ;;  %v1314_v27 = vpop.f32.mrb[0].mxu1  ;;  %v583_v28 = vpop.f32.mrb[1].mxu0  ;;  %v1241_v23 = vunpack.c.h.bf16 %v1271_v59 }
  0xf0   : > { %v834_v31 = vadd.f32 %v1314_v27, %v1627_v20  ;;  %v816_v32 = vadd.f32 %v1627_v20, %v583_v28  ;;  %v647_v33 = vpop.f32.mrb[1].mxu1  ;;  %v1299_v34 = vpop.f32.mrb[2].mxu0 }
  0xf1   : > { %v914_v37 = vadd.f32 %v1204_v22, %v818_v26  ;;  %v832_v38 = vadd.f32 %v1627_v20, %v647_v33  ;;  %v819_v39 = vadd.f32 %v1299_v34, %v1627_v20  ;;  %v1315_v40 = vpop.f32.mrb[2].mxu1  ;;  %v586_v41 = vpop.f32.mrb[3].mxu0  ;;  %v1274_v34 = vld [vmem:[%s1618_s12 + $0x68] sm:$0xff]  }
  0xf2   : > { %v930_v43 = vadd.f32 %v1236_v24, %v834_v31  ;;  %v912_v44 = vadd.f32 %v1200_v25, %v816_v32  ;;  %v835_v45 = vadd.f32 %v1315_v40, %v1627_v20  ;;  %v817_v46 = vadd.f32 %v1627_v20, %v586_v41  ;;  %v650_v47 = vpop.f32.mrb[3].mxu1  ;;  %v1273_v40 = vld [vmem:[%s1618_s12 + $0x60] sm:$0xff]  }
  0xf3   : > { %v946_v49 = vmax.f32 %v914_v37, 0.0  ;;  %v928_v50 = vadd.f32 %v1232_v29, %v832_v38  ;;  %v915_v51 = vadd.f32 %v1205_v30, %v819_v39  ;;  %v833_v52 = vadd.f32 %v1627_v20, %v650_v47  ;;  %v1266_v29 = vld [vmem:[%s1618_s12 + $0x28] sm:$0xff]  }
  0xf4   : > { %v962_v55 = vmax.f32 %v930_v43, 0.0  ;;  %v944_v56 = vmax.f32 %v912_v44, 0.0  ;;  %v931_v57 = vadd.f32 %v1237_v35, %v835_v45  ;;  %v913_v58 = vadd.f32 %v1201_v36, %v817_v46  ;;  %v1265_v35 = vld [vmem:[%s1618_s12 + $0x20] sm:$0xff]  }
  0xf5   : > { %978 = vst [vmem:[%s1647_s24 + $0x10] sm:$0xff] %v946_v49  ;;  %v960_v60 = vmax.f32 %v928_v50, 0.0  ;;  %v947_v61 = vmax.f32 %v915_v51, 0.0  ;;  %v929_v62 = vadd.f32 %v1233_v42, %v833_v52  ;;  %v1220_v44 = vunpack.c.l.bf16 %v1266_v29 }
  0xf6   : > { %994 = vst [vmem:[%s1647_s24 + $0x90] sm:$0xff] %v962_v55  ;;  %976 = vst [vmem:[%s1647_s24] sm:$0xff] %v944_v56  ;;  %v963_v0 = vmax.f32 %v931_v57, 0.0  ;;  %v945_v1 = vmax.f32 %v913_v58, 0.0  ;;  %v1302_v2 = vpop.f32.mrb[4].mxu0  ;;  %v1252_v48 = vunpack.c.l.bf16 %v1274_v34  ;;  %v1216_v49 = vunpack.c.l.bf16 %v1265_v35 }
  0xf7   : > { %992 = vst [vmem:[%s1647_s24 + $0x80] sm:$0xff] %v960_v60  ;;  %979 = vst [vmem:[%s1647_s24 + $0x18] sm:$0xff] %v947_v61  ;;  %v961_v5 = vmax.f32 %v929_v62, 0.0  ;;  %v822_v6 = vadd.f32 %v1302_v2, %v1627_v20  ;;  %v1318_v7 = vpop.f32.mrb[4].mxu1  ;;  %v599_v8 = vpop.f32.mrb[5].mxu0  ;;  %v1248_v54 = vunpack.c.l.bf16 %v1273_v40  ;;  %v1221_v55 = vunpack.c.h.bf16 %v1266_v29 }
  0xf8   : > { %995 = vst [vmem:[%s1647_s24 + $0x98] sm:$0xff] %v963_v0  ;;  %977 = vst [vmem:[%s1647_s24 + $0x8] sm:$0xff] %v945_v1  ;;  %v838_v11 = vadd.f32 %v1318_v7, %v1627_v20  ;;  %v820_v12 = vadd.f32 %v1627_v20, %v599_v8  ;;  %v663_v13 = vpop.f32.mrb[5].mxu1  ;;  %v1303_v14 = vpop.f32.mrb[6].mxu0  ;;  %v1253_v60 = vunpack.c.h.bf16 %v1274_v34  ;;  %v1217_v61 = vunpack.c.h.bf16 %v1265_v35 }
  0xf9   : > { %993 = vst [vmem:[%s1647_s24 + $0x88] sm:$0xff] %v961_v5  ;;  %v918_v17 = vadd.f32 %v1212_v63, %v822_v6  ;;  %v836_v18 = vadd.f32 %v1627_v20, %v663_v13  ;;  %v823_v19 = vadd.f32 %v1303_v14, %v1627_v20  ;;  %v1319_v21 = vpop.f32.mrb[6].mxu1  ;;  %v602_v22 = vpop.f32.mrb[7].mxu0  ;;  %v1276_v14 = vld [vmem:[%s1618_s12 + $0x78] sm:$0xff]  }
  0xfa   : > { %v934_v24 = vadd.f32 %v1244_v3, %v838_v11  ;;  %v916_v25 = vadd.f32 %v1208_v4, %v820_v12  ;;  %v839_v26 = vadd.f32 %v1319_v21, %v1627_v20  ;;  %v821_v27 = vadd.f32 %v1627_v20, %v602_v22  ;;  %v666_v28 = vpop.f32.mrb[7].mxu1  ;;  %v1275_v21 = vld [vmem:[%s1618_s12 + $0x70] sm:$0xff]  }
  0xfb   : > { %v950_v30 = vmax.f32 %v918_v17, 0.0  ;;  %v932_v31 = vadd.f32 %v1240_v9, %v836_v18  ;;  %v919_v32 = vadd.f32 %v1213_v10, %v823_v19  ;;  %v837_v33 = vadd.f32 %v1627_v20, %v666_v28  ;;  %v1268_v9 = vld [vmem:[%s1618_s12 + $0x38] sm:$0xff]  }
  0xfc   : > { %v966_v36 = vmax.f32 %v934_v24, 0.0  ;;  %v948_v37 = vmax.f32 %v916_v25, 0.0  ;;  %v935_v38 = vadd.f32 %v1245_v15, %v839_v26  ;;  %v917_v39 = vadd.f32 %v1209_v16, %v821_v27  ;;  %v1267_v15 = vld [vmem:[%s1618_s12 + $0x30] sm:$0xff]  }
  0xfd   : > { %982 = vst [vmem:[%s1647_s24 + $0x30] sm:$0xff] %v950_v30  ;;  %v964_v41 = vmax.f32 %v932_v31, 0.0  ;;  %v951_v42 = vmax.f32 %v919_v32, 0.0  ;;  %v933_v43 = vadd.f32 %v1241_v23, %v837_v33  ;;  %v1249_v3 = vunpack.c.h.bf16 %v1273_v40 }
  0xfe   : > { %998 = vst [vmem:[%s1647_s24 + $0xb0] sm:$0xff] %v966_v36  ;;  %980 = vst [vmem:[%s1647_s24 + $0x20] sm:$0xff] %v948_v37  ;;  %v967_v45 = vmax.f32 %v935_v38, 0.0  ;;  %v949_v46 = vmax.f32 %v917_v39, 0.0  ;;  %v1306_v47 = vpop.f32.mrb[8].mxu0  ;;  %v1228_v25 = vunpack.c.l.bf16 %v1268_v9  ;;  %v1260_v29 = vunpack.c.l.bf16 %v1276_v14 }
  0xff   : > { %996 = vst [vmem:[%s1647_s24 + $0xa0] sm:$0xff] %v964_v41  ;;  %983 = vst [vmem:[%s1647_s24 + $0x38] sm:$0xff] %v951_v42  ;;  %v965_v50 = vmax.f32 %v933_v43, 0.0  ;;  %v826_v51 = vadd.f32 %v1306_v47, %v1627_v20  ;;  %v1322_v52 = vpop.f32.mrb[8].mxu1  ;;  %v615_v53 = vpop.f32.mrb[9].mxu0  ;;  %v1224_v30 = vunpack.c.l.bf16 %v1267_v15  ;;  %v1256_v35 = vunpack.c.l.bf16 %v1275_v21 }
 0x100   : > { %999 = vst [vmem:[%s1647_s24 + $0xb8] sm:$0xff] %v967_v45  ;;  %981 = vst [vmem:[%s1647_s24 + $0x28] sm:$0xff] %v949_v46  ;;  %v842_v56 = vadd.f32 %v1322_v52, %v1627_v20  ;;  %v824_v57 = vadd.f32 %v1627_v20, %v615_v53  ;;  %v679_v58 = vpop.f32.mrb[9].mxu1  ;;  %v1307_v59 = vpop.f32.mrb[10].mxu0  ;;  %v1229_v36 = vunpack.c.h.bf16 %v1268_v9  ;;  %v1261_v41 = vunpack.c.h.bf16 %v1276_v14 }
 0x101   : > { %997 = vst [vmem:[%s1647_s24 + $0xa8] sm:$0xff] %v965_v50  ;;  %v922_v62 = vadd.f32 %v1220_v44, %v826_v51  ;;  %v840_v63 = vadd.f32 %v1627_v20, %v679_v58  ;;  %v827_v0 = vadd.f32 %v1307_v59, %v1627_v20  ;;  %v1323_v1 = vpop.f32.mrb[10].mxu1  ;;  %v618_v2 = vpop.f32.mrb[11].mxu0  ;;  %v1225_v42 = vunpack.c.h.bf16 %v1267_v15 }
 0x102   : > { %v938_v4 = vadd.f32 %v1252_v48, %v842_v56  ;;  %v920_v5 = vadd.f32 %v1216_v49, %v824_v57  ;;  %v843_v6 = vadd.f32 %v1323_v1, %v1627_v20  ;;  %v825_v7 = vadd.f32 %v1627_v20, %v618_v2  ;;  %v682_v8 = vpop.f32.mrb[11].mxu1 }
 0x103   : > { %v954_v10 = vmax.f32 %v922_v62, 0.0  ;;  %v936_v11 = vadd.f32 %v1248_v54, %v840_v63  ;;  %v923_v12 = vadd.f32 %v1221_v55, %v827_v0  ;;  %v841_v13 = vadd.f32 %v1627_v20, %v682_v8 }
 0x104   : > { %v970_v16 = vmax.f32 %v938_v4, 0.0  ;;  %v952_v17 = vmax.f32 %v920_v5, 0.0  ;;  %v939_v18 = vadd.f32 %v1253_v60, %v843_v6  ;;  %v921_v19 = vadd.f32 %v1217_v61, %v825_v7 }
 0x105   : > { %986 = vst [vmem:[%s1647_s24 + $0x50] sm:$0xff] %v954_v10  ;;  %v968_v22 = vmax.f32 %v936_v11, 0.0  ;;  %v955_v23 = vmax.f32 %v923_v12, 0.0  ;;  %v937_v24 = vadd.f32 %v1249_v3, %v841_v13  ;;  %v1257_v48 = vunpack.c.h.bf16 %v1275_v21 }
 0x106   : > { %1002 = vst [vmem:[%s1647_s24 + $0xd0] sm:$0xff] %v970_v16  ;;  %984 = vst [vmem:[%s1647_s24 + $0x40] sm:$0xff] %v952_v17  ;;  %v971_v26 = vmax.f32 %v939_v18, 0.0  ;;  %v953_v27 = vmax.f32 %v921_v19, 0.0  ;;  %v1310_v28 = vpop.f32.mrb[12].mxu0 }
 0x107   : > { %1000 = vst [vmem:[%s1647_s24 + $0xc0] sm:$0xff] %v968_v22  ;;  %987 = vst [vmem:[%s1647_s24 + $0x58] sm:$0xff] %v955_v23  ;;  %v969_v31 = vmax.f32 %v937_v24, 0.0  ;;  %v830_v32 = vadd.f32 %v1310_v28, %v1627_v20  ;;  %v1326_v33 = vpop.f32.mrb[12].mxu1  ;;  %v631_v34 = vpop.f32.mrb[13].mxu0 }
 0x108   : > { %1003 = vst [vmem:[%s1647_s24 + $0xd8] sm:$0xff] %v971_v26  ;;  %985 = vst [vmem:[%s1647_s24 + $0x48] sm:$0xff] %v953_v27  ;;  %v846_v37 = vadd.f32 %v1326_v33, %v1627_v20  ;;  %v828_v38 = vadd.f32 %v1627_v20, %v631_v34  ;;  %v695_v39 = vpop.f32.mrb[13].mxu1  ;;  %v1311_v40 = vpop.f32.mrb[14].mxu0 }
 0x109   : > { %1001 = vst [vmem:[%s1647_s24 + $0xc8] sm:$0xff] %v969_v31  ;;  %v926_v43 = vadd.f32 %v1228_v25, %v830_v32  ;;  %v844_v44 = vadd.f32 %v1627_v20, %v695_v39  ;;  %v831_v45 = vadd.f32 %v1311_v40, %v1627_v20  ;;  %v1327_v46 = vpop.f32.mrb[14].mxu1  ;;  %v634_v47 = vpop.f32.mrb[15].mxu0 }
 0x10a   : > { %v942_v49 = vadd.f32 %v1260_v29, %v846_v37  ;;  %v924_v50 = vadd.f32 %v1224_v30, %v828_v38  ;;  %v847_v51 = vadd.f32 %v1327_v46, %v1627_v20  ;;  %v829_v52 = vadd.f32 %v1627_v20, %v634_v47  ;;  %v698_v53 = vpop.f32.mrb[15].mxu1 }
 0x10b   : > { %v958_v54 = vmax.f32 %v926_v43, 0.0  ;;  %v940_v55 = vadd.f32 %v1256_v35, %v844_v44  ;;  %v927_v56 = vadd.f32 %v1229_v36, %v831_v45  ;;  %v845_v57 = vadd.f32 %v1627_v20, %v698_v53 }
 0x10c   : > { %v974_v58 = vmax.f32 %v942_v49, 0.0  ;;  %v956_v59 = vmax.f32 %v924_v50, 0.0  ;;  %v943_v60 = vadd.f32 %v1261_v41, %v847_v51  ;;  %v925_v61 = vadd.f32 %v1225_v42, %v829_v52 }
 0x10d   : > { %990 = vst [vmem:[%s1647_s24 + $0x70] sm:$0xff] %v958_v54  ;;  %v972_v62 = vmax.f32 %v940_v55, 0.0  ;;  %v959_v63 = vmax.f32 %v927_v56, 0.0  ;;  %v941_v0 = vadd.f32 %v1257_v48, %v845_v57 }
 0x10e   : > { %1006 = vst [vmem:[%s1647_s24 + $0xf0] sm:$0xff] %v974_v58  ;;  %988 = vst [vmem:[%s1647_s24 + $0x60] sm:$0xff] %v956_v59  ;;  %v975_v20 = vmax.f32 %v943_v60, 0.0  ;;  %v957_v1 = vmax.f32 %v925_v61, 0.0 }
 0x10f   : > { %1004 = vst [vmem:[%s1647_s24 + $0xe0] sm:$0xff] %v972_v62  ;;  %991 = vst [vmem:[%s1647_s24 + $0x78] sm:$0xff] %v959_v63  ;;  %v973_v2 = vmax.f32 %v941_v0, 0.0 }
 0x110   : > { %1007 = vst [vmem:[%s1647_s24 + $0xf8] sm:$0xff] %v975_v20  ;;  %989 = vst [vmem:[%s1647_s24 + $0x68] sm:$0xff] %v957_v1 }
 0x111   : > { %1005 = vst [vmem:[%s1647_s24 + $0xe8] sm:$0xff] %v973_v2 }
 0x112   : > { %1417 = shalt.err (!%p1414_p5)
}
 0x113   : > { %s1418_s11 = scalar_lea.hbm %s1713_s5, 4096  ;;  %s1422_s14 = scalar_lea.hbm %s1774_s4, 8192 }
 0x114   : > { %p1419_p6 = scmp.ne.s32.totalorder %s1713_s5, %s1418_s11  ;;  %p1423_p10 = scmp.lt.u32.totalorder %s1713_s5, %s1774_s4 }
 0x115   : > { %p1424_p11 = scmp.lt.u32.totalorder %s1422_s14, %s1418_s11  ;;  %p1426_p13 = scmp.lt.u32.totalorder %s1418_s11, %s1713_s5 }
 0x116   : > { %p1420_p7 = pnand %p1419_p6, %p1552_p4 }
 0x117   : > { %p1425_p12 = por %p1424_p11, %p1423_p10 }
 0x118   : > { %p1421_p9 = pneg %p1420_p7 }
 0x119   : > { %p1427_p0 = por %p1426_p13, %p1425_p12 }
 0x11b   : > { %p1428_p1 = pnand %p1427_p0, %p1421_p9 }
 0x11d   : > { %1431 = shalt.err (!%p1428_p1)
}
 0x11e   : > { %s1485_s24 = smov 128   ;;  %s1486_s26 = smov 8  }
 0x11f   : > { %1330 = dma.vmem_to_hbm [thread:$0]  (%p1552_p4), %s1715_s29, 4096, %s1713_s5, %s1724_s6, %s1485_s24, %s1485_s24, %s1486_s26  }
 0x120 PF: > { %p1336_p2 = scmp.ge.s32.totalorder %s1482_s20, 2  ;;  %s1038_s18 = sand.u32 1, %s1462_s15  }
 0x121   : > { %s1039_s30 = scalar_lea.sflag [#allocation4], %s1038_s18 }
 0x122   : > { %p1333_p3 = pnand %p1336_p2, %p1559_p8 }
 0x124   : > { %1457 = dma.done.wait (!%p1333_p3), %s1039_s30, 4096  }
 0x125   : > { %1459 = vsyncadd (!%p1333_p3), %s1039_s30, 4294963200  ;;  %s17_s20 = sadd.s32 1, %s1482_s20   ;;  %s1777_s15 = smov %s1466_s16 }
 0x126   : > { %p14_p5 = scmp.ge.s32.totalorder %s17_s20, 4   ;;  %s1778_s16 = smov %s1470_s17 }
 0x127   : > { %s1779_s17 = smov %s1565_s28  ;;  %s1780_s18 = smov %s1478_s19 }
 0x128   : > { %s1781_s19 = smov %s1783_s23  ;;  %16 = sbr.rel (!%p14_p5) target bundleno = 4 (0x4), region = 88 }
 0x12f   :  { %1044 = vsyncpa [#allocation4], 1 }
 0x130   :  { %1046 = vsyncpa [#allocation4 + $0x1], 1 }

</bundles_post_ra>
